<compile_context>
chip_gen: v6e
topology: v6e:2x2x1
jax: 0.10.0
libtpu: 0.0.40
codegen_flags: <defaults>
</compile_context>

<pallas_src>
import functools

import jax
import jax.numpy as jnp
from jax.experimental import pallas as pl
from jax.experimental.pallas import tpu as pltpu


# ---------------------------------------------------------------------------
# Fused kernel: LayerNorm -> per-head qkv -> (q k^T) v -> accumulated to_out
# ---------------------------------------------------------------------------
def _prenorm_attn_kernel(x_ref, g_ref, beta_ref, wq_ref, wk_ref, wv_ref,
                         wo_ref, bo_ref, o_ref, *, heads, compute_dtype, eps):
    Bp, N, dim = x_ref.shape
    D = wq_ref.shape[-1]
    BN = Bp * N

    # --- LayerNorm(dim) in f32 (PyTorch nn.LayerNorm, eps=1e-5, affine) ------
    xf = x_ref[...].reshape(BN, dim).astype(jnp.float32)      # merge majors: free
    mu = jnp.mean(xf, axis=-1, keepdims=True)
    xc = xf - mu
    var = jnp.mean(xc * xc, axis=-1, keepdims=True)
    xn = xc * jax.lax.rsqrt(var + eps)                        # rsqrt -> EUP slot
    xn = xn * g_ref[...] + beta_ref[...]                      # (1, dim) broadcast
    xn_c = xn.astype(compute_dtype)                           # cast once for MXU

    # --- per-head attention with accumulated output projection ---------------
    acc = jnp.zeros((BN, dim), jnp.float32)
    for h in range(heads):                                    # unrolled, static
        # Per-head weights are leading-dim slices of prefetched VMEM refs (free);
        # all matmul outputs live at lane offset 0 (no mid-vreg extraction).
        q = jnp.dot(xn_c, wq_ref[h],
                    preferred_element_type=jnp.float32).reshape(Bp, N, D)
        k = jnp.dot(xn_c, wk_ref[h],
                    preferred_element_type=jnp.float32).reshape(Bp, N, D)
        v = jnp.dot(xn_c, wv_ref[h],
                    preferred_element_type=jnp.float32).reshape(Bp, N, D)

        # (q @ k^T) @ v with NO softmax, batched over the Bp batch rows; kept
        # in f32 (dots magnitudes grow with N*D, so no bf16 requantization here).
        dots = jnp.einsum('bnd,bmd->bnm', q, k,
                          preferred_element_type=jnp.float32)          # (Bp,N,N)
        o_h = jnp.einsum('bnm,bmd->bnd', dots, v,
                         preferred_element_type=jnp.float32)           # (Bp,N,D)

        # Accumulate to_out projection per head -> no concat relayout.
        acc = acc + jnp.dot(o_h.reshape(BN, D).astype(compute_dtype), wo_ref[h],
                            preferred_element_type=jnp.float32)        # (BN,dim)

    out = acc + bo_ref[...]                                   # bias; Dropout(0.0)=id
    o_ref[...] = out.reshape(Bp, N, dim).astype(o_ref.dtype)


def _multi_tensorcore_device() -> bool:
    """True only for parts with >1 TensorCore per device (v7x, v4/v5p megacore)."""
    try:
        kind = jax.devices()[0].device_kind.lower()
    except Exception:
        return False
    return ("v7" in kind) or ("v4" in kind) or ("v5p" in kind)


# ---------------------------------------------------------------------------
# Wrapper: host-side weight prep + one fused pallas_call
# ---------------------------------------------------------------------------
def prenorm_no_softmax_attention_forward(x, params, heads,
                                         compute_dtype=jnp.float32, eps=1e-5,
                                         batch_grid=None):
    """x: (B, N, dim).  params: ln_gamma/ln_beta (dim,), w_qkv (dim, 3*inner),
    w_out (inner, dim), b_out (dim,).  Returns (B, N, dim)."""
    B, N, dim = x.shape
    w_qkv = params["w_qkv"]
    inner = w_qkv.shape[1] // 3
    D = inner // heads

    # Host-side weight prep (one-time cost per parameter set in real use):
    # split q|k|v, make heads the leading dim, pre-cast to the compute dtype.
    wqkv_h = w_qkv.reshape(dim, 3, heads, D).transpose(1, 2, 0, 3)  # (3,H,dim,D)
    wq = wqkv_h[0].astype(compute_dtype)
    wk = wqkv_h[1].astype(compute_dtype)
    wv = wqkv_h[2].astype(compute_dtype)
    wo = params["w_out"].reshape(heads, D, dim).astype(compute_dtype)  # (H,D,dim)

    if batch_grid is None:
        batch_grid = (B > 1) and _multi_tensorcore_device()
    num_steps = B if batch_grid else 1           # single step on 1-TC chips
    Bp = B // num_steps

    kernel = functools.partial(_prenorm_attn_kernel, heads=heads,
                               compute_dtype=compute_dtype, eps=eps)

    return pl.pallas_call(
        kernel,
        out_shape=jax.ShapeDtypeStruct((B, N, dim), x.dtype),
        grid=(num_steps,),
        in_specs=[
            pl.BlockSpec((Bp, N, dim), lambda i: (i, 0, 0)),        # x
            pl.BlockSpec((1, dim), lambda i: (0, 0)),               # ln_gamma
            pl.BlockSpec((1, dim), lambda i: (0, 0)),               # ln_beta
            pl.BlockSpec((heads, dim, D), lambda i: (0, 0, 0)),     # W_q per head
            pl.BlockSpec((heads, dim, D), lambda i: (0, 0, 0)),     # W_k per head
            pl.BlockSpec((heads, dim, D), lambda i: (0, 0, 0)),     # W_v per head
            pl.BlockSpec((heads, D, dim), lambda i: (0, 0, 0)),     # W_out per head
            pl.BlockSpec((1, dim), lambda i: (0, 0)),               # b_out
        ],
        out_specs=pl.BlockSpec((Bp, N, dim), lambda i: (i, 0, 0)),
        compiler_params=pltpu.CompilerParams(
            dimension_semantics=("parallel",)),     # only matters on multi-TC parts
    )(
        x,
        params["ln_gamma"].reshape(1, dim).astype(jnp.float32),
        params["ln_beta"].reshape(1, dim).astype(jnp.float32),
        wq, wk, wv, wo,
        params["b_out"].reshape(1, dim).astype(jnp.float32),
    )


# ---------------------------------------------------------------------------
# Pure-JAX reference (PreNorm -> NoSoftMaxAttention) for correctness checking
# ---------------------------------------------------------------------------
def _reference_forward(x, params, heads, eps=1e-5):
    B, N, dim = x.shape
    inner = params["w_qkv"].shape[1] // 3
    dim_head = inner // heads
    mu = x.mean(-1, keepdims=True)
    var = ((x - mu) ** 2).mean(-1, keepdims=True)
    xn = (x - mu) / jnp.sqrt(var + eps) * params["ln_gamma"] + params["ln_beta"]
    qkv = xn @ params["w_qkv"]
    q, k, v = jnp.split(qkv, 3, axis=-1)
    rh = lambda t: t.reshape(B, N, heads, dim_head).transpose(0, 2, 1, 3)
    q, k, v = rh(q), rh(k), rh(v)
    dots = jnp.einsum("bhnd,bhmd->bhnm", q, k)
    out = jnp.einsum("bhnm,bhmd->bhnd", dots, v)
    out = out.transpose(0, 2, 1, 3).reshape(B, N, inner)
    return out @ params["w_out"] + params["b_out"]


if __name__ == "__main__":
    # Shapes implied by the module: x (batch, seq, dim); heads=8, dim_head=64
    batch, seq, dim = 2, 8, 32
    heads, dim_head = 8, 64
    inner = heads * dim_head  # 512

    key = jax.random.PRNGKey(0)
    k_x, k_qkv, k_wo, k_bo, k_g, k_b = jax.random.split(key, 6)

    x = jax.random.normal(k_x, (batch, seq, dim), dtype=jnp.float32)

    params = {
        "ln_gamma": 1.0 + 0.1 * jax.random.normal(k_g, (dim,), jnp.float32),
        "ln_beta": 0.1 * jax.random.normal(k_b, (dim,), jnp.float32),
        # to_qkv.weight^T : (dim, 3*inner)
        "w_qkv": jax.random.uniform(
            k_qkv, (dim, 3 * inner), jnp.float32, -1.0, 1.0) / jnp.sqrt(dim),
        # to_out[0].weight^T : (inner, dim)
        "w_out": jax.random.uniform(
            k_wo, (inner, dim), jnp.float32, -1.0, 1.0) / jnp.sqrt(inner),
        # to_out[0].bias : (dim,)
        "b_out": jax.random.uniform(
            k_bo, (dim,), jnp.float32, -1.0, 1.0) / jnp.sqrt(inner),
    }

    ref = _reference_forward(x, params, heads)

    # f32 compute, auto grid (single step on v5e/v6e, grid=(B,) on multi-TC parts)
    out = prenorm_no_softmax_attention_forward(x, params, heads,
                                               compute_dtype=jnp.float32)
    out = jax.block_until_ready(out)
    assert out.shape == (batch, seq, dim)
    assert jnp.allclose(out, ref, atol=2e-3, rtol=2e-3), "f32 mismatch vs reference"

    # f32 compute, explicit per-batch grid (exercises the v7x path everywhere)
    out_g = prenorm_no_softmax_attention_forward(x, params, heads,
                                                 compute_dtype=jnp.float32,
                                                 batch_grid=True)
    out_g = jax.block_until_ready(out_g)
    assert jnp.allclose(out_g, ref, atol=2e-3, rtol=2e-3), "grid path mismatch"

    # bf16 projection path (weights pre-cast on host; attention kept in f32)
    out_bf16 = prenorm_no_softmax_attention_forward(x, params, heads,
                                                    compute_dtype=jnp.bfloat16)
    out_bf16 = jax.block_until_ready(out_bf16)
    assert jnp.allclose(out_bf16, ref, atol=1e-1, rtol=5e-2), "bf16 mismatch vs reference"

    print("KERNEL_OK")
</pallas_src>

<mosaic_0001>
module attributes {stable_mosaic.version = 11 : i64} {
  func.func @_prenorm_attn_kernel(%arg0: i32, %arg1: memref<2x8x32xf32, #tpu.memory_space<vmem>>, %arg2: memref<1x32xf32, #tpu.memory_space<vmem>>, %arg3: memref<1x32xf32, #tpu.memory_space<vmem>>, %arg4: memref<8x32x64xf32, #tpu.memory_space<vmem>>, %arg5: memref<8x32x64xf32, #tpu.memory_space<vmem>>, %arg6: memref<8x32x64xf32, #tpu.memory_space<vmem>>, %arg7: memref<8x64x32xf32, #tpu.memory_space<vmem>>, %arg8: memref<1x32xf32, #tpu.memory_space<vmem>>, %arg9: memref<2x8x32xf32, #tpu.memory_space<vmem>>) attributes {dimension_semantics = [#tpu.dimension_semantics<parallel>], iteration_bounds = array<i64: 1>, scalar_prefetch = 0 : i64, scratch_operands = 0 : i64, tpu.core_type = #tpu.core_type<tc>, window_params = [{transform_indices = @transform_0, window_bounds = array<i64: 2, 8, 32>}, {pipeline_mode = #tpu.pipeline_mode<synchronous>, transform_indices = @transform_1, window_bounds = array<i64: 1, 32>}, {pipeline_mode = #tpu.pipeline_mode<synchronous>, transform_indices = @transform_2, window_bounds = array<i64: 1, 32>}, {pipeline_mode = #tpu.pipeline_mode<synchronous>, transform_indices = @transform_3, window_bounds = array<i64: 8, 32, 64>}, {pipeline_mode = #tpu.pipeline_mode<synchronous>, transform_indices = @transform_4, window_bounds = array<i64: 8, 32, 64>}, {pipeline_mode = #tpu.pipeline_mode<synchronous>, transform_indices = @transform_5, window_bounds = array<i64: 8, 32, 64>}, {pipeline_mode = #tpu.pipeline_mode<synchronous>, transform_indices = @transform_6, window_bounds = array<i64: 8, 64, 32>}, {pipeline_mode = #tpu.pipeline_mode<synchronous>, transform_indices = @transform_7, window_bounds = array<i64: 1, 32>}, {transform_indices = @transform_8, window_bounds = array<i64: 2, 8, 32>}]} {
    %c0 = arith.constant 0 : index
    %c0_0 = arith.constant 0 : index
    %c0_1 = arith.constant 0 : index
    %0 = vector.load %arg1[%c0, %c0_0, %c0_1] : memref<2x8x32xf32, #tpu.memory_space<vmem>>, vector<2x8x32xf32>
    %1 = vector.shape_cast %0 : vector<2x8x32xf32> to vector<16x32xf32>
    %cst = arith.constant dense<0.000000e+00> : vector<16xf32>
    %2 = vector.multi_reduction <add>, %1, %cst [1] : vector<16x32xf32> to vector<16xf32>
    %3 = vector.shape_cast %2 : vector<16xf32> to vector<16x1xf32>
    %cst_2 = arith.constant 3.200000e+01 : f32
    %4 = vector.broadcast %cst_2 : f32 to vector<16x1xf32>
    %5 = arith.divf %3, %4 : vector<16x1xf32>
    %6 = vector.broadcast %5 : vector<16x1xf32> to vector<16x32xf32>
    %7 = arith.subf %1, %6 : vector<16x32xf32>
    %8 = arith.mulf %7, %7 : vector<16x32xf32>
    %cst_3 = arith.constant dense<0.000000e+00> : vector<16xf32>
    %9 = vector.multi_reduction <add>, %8, %cst_3 [1] : vector<16x32xf32> to vector<16xf32>
    %10 = vector.shape_cast %9 : vector<16xf32> to vector<16x1xf32>
    %cst_4 = arith.constant 3.200000e+01 : f32
    %11 = vector.broadcast %cst_4 : f32 to vector<16x1xf32>
    %12 = arith.divf %10, %11 : vector<16x1xf32>
    %cst_5 = arith.constant 9.99999974E-6 : f32
    %13 = vector.broadcast %cst_5 : f32 to vector<16x1xf32>
    %14 = arith.addf %12, %13 : vector<16x1xf32>
    %15 = math.rsqrt %14 : vector<16x1xf32>
    %16 = vector.broadcast %15 : vector<16x1xf32> to vector<16x32xf32>
    %17 = arith.mulf %7, %16 : vector<16x32xf32>
    %c0_6 = arith.constant 0 : index
    %c0_7 = arith.constant 0 : index
    %18 = vector.load %arg2[%c0_6, %c0_7] : memref<1x32xf32, #tpu.memory_space<vmem>>, vector<1x32xf32>
    %19 = vector.broadcast %18 : vector<1x32xf32> to vector<16x32xf32>
    %20 = arith.mulf %17, %19 : vector<16x32xf32>
    %c0_8 = arith.constant 0 : index
    %c0_9 = arith.constant 0 : index
    %21 = vector.load %arg3[%c0_8, %c0_9] : memref<1x32xf32, #tpu.memory_space<vmem>>, vector<1x32xf32>
    %22 = vector.broadcast %21 : vector<1x32xf32> to vector<16x32xf32>
    %23 = arith.addf %20, %22 : vector<16x32xf32>
    %cst_10 = arith.constant 0.000000e+00 : f32
    %24 = vector.broadcast %cst_10 : f32 to vector<16x32xf32>
    %c0_11 = arith.constant 0 : index
    %c0_12 = arith.constant 0 : index
    %c0_13 = arith.constant 0 : index
    %25 = vector.load %arg4[%c0_11, %c0_12, %c0_13] : memref<8x32x64xf32, #tpu.memory_space<vmem>>, vector<1x32x64xf32>
    %26 = vector.shape_cast %25 : vector<1x32x64xf32> to vector<32x64xf32>
    %cst_14 = arith.constant dense<0.000000e+00> : vector<16x64xf32>
    %27 = tpu.matmul %23, %26, %cst_14 {dimension_numbers = #tpu.dot_dimension_numbers<[1], [0], [0], [1], [0, 0, 1, 1], [], []>} : vector<16x32xf32>, vector<32x64xf32>, vector<16x64xf32> -> vector<16x64xf32>
    %28 = vector.shape_cast %27 : vector<16x64xf32> to vector<2x8x64xf32>
    %c0_15 = arith.constant 0 : index
    %c0_16 = arith.constant 0 : index
    %c0_17 = arith.constant 0 : index
    %29 = vector.load %arg5[%c0_15, %c0_16, %c0_17] : memref<8x32x64xf32, #tpu.memory_space<vmem>>, vector<1x32x64xf32>
    %30 = vector.shape_cast %29 : vector<1x32x64xf32> to vector<32x64xf32>
    %cst_18 = arith.constant dense<0.000000e+00> : vector<16x64xf32>
    %31 = tpu.matmul %23, %30, %cst_18 {dimension_numbers = #tpu.dot_dimension_numbers<[1], [0], [0], [1], [0, 0, 1, 1], [], []>} : vector<16x32xf32>, vector<32x64xf32>, vector<16x64xf32> -> vector<16x64xf32>
    %32 = vector.shape_cast %31 : vector<16x64xf32> to vector<2x8x64xf32>
    %c0_19 = arith.constant 0 : index
    %c0_20 = arith.constant 0 : index
    %c0_21 = arith.constant 0 : index
    %33 = vector.load %arg6[%c0_19, %c0_20, %c0_21] : memref<8x32x64xf32, #tpu.memory_space<vmem>>, vector<1x32x64xf32>
    %34 = vector.shape_cast %33 : vector<1x32x64xf32> to vector<32x64xf32>
    %cst_22 = arith.constant dense<0.000000e+00> : vector<16x64xf32>
    %35 = tpu.matmul %23, %34, %cst_22 {dimension_numbers = #tpu.dot_dimension_numbers<[1], [0], [0], [1], [0, 0, 1, 1], [], []>} : vector<16x32xf32>, vector<32x64xf32>, vector<16x64xf32> -> vector<16x64xf32>
    %36 = vector.shape_cast %35 : vector<16x64xf32> to vector<2x8x64xf32>
    "tpu.trace_start"() <{level = 10 : i32, message = "bnd,bmd->bnm"}> : () -> ()
    %cst_23 = arith.constant dense<0.000000e+00> : vector<2x8x8xf32>
    %37 = tpu.matmul %28, %32, %cst_23 {dimension_numbers = #tpu.dot_dimension_numbers<[2], [2], [1], [1], [0, 0, 0, 1, 1, 1], [0], [0]>} : vector<2x8x64xf32>, vector<2x8x64xf32>, vector<2x8x8xf32> -> vector<2x8x8xf32>
    "tpu.trace_stop"() : () -> ()
    "tpu.trace_start"() <{level = 10 : i32, message = "bnm,bmd->bnd"}> : () -> ()
    %cst_24 = arith.constant dense<0.000000e+00> : vector<2x8x64xf32>
    %38 = tpu.matmul %37, %36, %cst_24 {dimension_numbers = #tpu.dot_dimension_numbers<[2], [1], [1], [2], [0, 0, 0, 1, 1, 2], [0], [0]>} : vector<2x8x8xf32>, vector<2x8x64xf32>, vector<2x8x64xf32> -> vector<2x8x64xf32>
    "tpu.trace_stop"() : () -> ()
    %39 = vector.shape_cast %38 : vector<2x8x64xf32> to vector<16x64xf32>
    %c0_25 = arith.constant 0 : index
    %c0_26 = arith.constant 0 : index
    %c0_27 = arith.constant 0 : index
    %40 = vector.load %arg7[%c0_25, %c0_26, %c0_27] : memref<8x64x32xf32, #tpu.memory_space<vmem>>, vector<1x64x32xf32>
    %41 = vector.shape_cast %40 : vector<1x64x32xf32> to vector<64x32xf32>
    %cst_28 = arith.constant dense<0.000000e+00> : vector<16x32xf32>
    %42 = tpu.matmul %39, %41, %cst_28 {dimension_numbers = #tpu.dot_dimension_numbers<[1], [0], [0], [1], [0, 0, 1, 1], [], []>} : vector<16x64xf32>, vector<64x32xf32>, vector<16x32xf32> -> vector<16x32xf32>
    %43 = arith.addf %24, %42 : vector<16x32xf32>
    %c1 = arith.constant 1 : index
    %c0_29 = arith.constant 0 : index
    %c0_30 = arith.constant 0 : index
    %44 = vector.load %arg4[%c1, %c0_29, %c0_30] : memref<8x32x64xf32, #tpu.memory_space<vmem>>, vector<1x32x64xf32>
    %45 = vector.shape_cast %44 : vector<1x32x64xf32> to vector<32x64xf32>
    %cst_31 = arith.constant dense<0.000000e+00> : vector<16x64xf32>
    %46 = tpu.matmul %23, %45, %cst_31 {dimension_numbers = #tpu.dot_dimension_numbers<[1], [0], [0], [1], [0, 0, 1, 1], [], []>} : vector<16x32xf32>, vector<32x64xf32>, vector<16x64xf32> -> vector<16x64xf32>
    %47 = vector.shape_cast %46 : vector<16x64xf32> to vector<2x8x64xf32>
    %c1_32 = arith.constant 1 : index
    %c0_33 = arith.constant 0 : index
    %c0_34 = arith.constant 0 : index
    %48 = vector.load %arg5[%c1_32, %c0_33, %c0_34] : memref<8x32x64xf32, #tpu.memory_space<vmem>>, vector<1x32x64xf32>
    %49 = vector.shape_cast %48 : vector<1x32x64xf32> to vector<32x64xf32>
    %cst_35 = arith.constant dense<0.000000e+00> : vector<16x64xf32>
    %50 = tpu.matmul %23, %49, %cst_35 {dimension_numbers = #tpu.dot_dimension_numbers<[1], [0], [0], [1], [0, 0, 1, 1], [], []>} : vector<16x32xf32>, vector<32x64xf32>, vector<16x64xf32> -> vector<16x64xf32>
    %51 = vector.shape_cast %50 : vector<16x64xf32> to vector<2x8x64xf32>
    %c1_36 = arith.constant 1 : index
    %c0_37 = arith.constant 0 : index
    %c0_38 = arith.constant 0 : index
    %52 = vector.load %arg6[%c1_36, %c0_37, %c0_38] : memref<8x32x64xf32, #tpu.memory_space<vmem>>, vector<1x32x64xf32>
    %53 = vector.shape_cast %52 : vector<1x32x64xf32> to vector<32x64xf32>
    %cst_39 = arith.constant dense<0.000000e+00> : vector<16x64xf32>
    %54 = tpu.matmul %23, %53, %cst_39 {dimension_numbers = #tpu.dot_dimension_numbers<[1], [0], [0], [1], [0, 0, 1, 1], [], []>} : vector<16x32xf32>, vector<32x64xf32>, vector<16x64xf32> -> vector<16x64xf32>
    %55 = vector.shape_cast %54 : vector<16x64xf32> to vector<2x8x64xf32>
    "tpu.trace_start"() <{level = 10 : i32, message = "bnd,bmd->bnm"}> : () -> ()
    %cst_40 = arith.constant dense<0.000000e+00> : vector<2x8x8xf32>
    %56 = tpu.matmul %47, %51, %cst_40 {dimension_numbers = #tpu.dot_dimension_numbers<[2], [2], [1], [1], [0, 0, 0, 1, 1, 1], [0], [0]>} : vector<2x8x64xf32>, vector<2x8x64xf32>, vector<2x8x8xf32> -> vector<2x8x8xf32>
    "tpu.trace_stop"() : () -> ()
    "tpu.trace_start"() <{level = 10 : i32, message = "bnm,bmd->bnd"}> : () -> ()
    %cst_41 = arith.constant dense<0.000000e+00> : vector<2x8x64xf32>
    %57 = tpu.matmul %56, %55, %cst_41 {dimension_numbers = #tpu.dot_dimension_numbers<[2], [1], [1], [2], [0, 0, 0, 1, 1, 2], [0], [0]>} : vector<2x8x8xf32>, vector<2x8x64xf32>, vector<2x8x64xf32> -> vector<2x8x64xf32>
    "tpu.trace_stop"() : () -> ()
    %58 = vector.shape_cast %57 : vector<2x8x64xf32> to vector<16x64xf32>
    %c1_42 = arith.constant 1 : index
    %c0_43 = arith.constant 0 : index
    %c0_44 = arith.constant 0 : index
    %59 = vector.load %arg7[%c1_42, %c0_43, %c0_44] : memref<8x64x32xf32, #tpu.memory_space<vmem>>, vector<1x64x32xf32>
    %60 = vector.shape_cast %59 : vector<1x64x32xf32> to vector<64x32xf32>
    %cst_45 = arith.constant dense<0.000000e+00> : vector<16x32xf32>
    %61 = tpu.matmul %58, %60, %cst_45 {dimension_numbers = #tpu.dot_dimension_numbers<[1], [0], [0], [1], [0, 0, 1, 1], [], []>} : vector<16x64xf32>, vector<64x32xf32>, vector<16x32xf32> -> vector<16x32xf32>
    %62 = arith.addf %43, %61 : vector<16x32xf32>
    %c2 = arith.constant 2 : index
    %c0_46 = arith.constant 0 : index
    %c0_47 = arith.constant 0 : index
    %63 = vector.load %arg4[%c2, %c0_46, %c0_47] : memref<8x32x64xf32, #tpu.memory_space<vmem>>, vector<1x32x64xf32>
    %64 = vector.shape_cast %63 : vector<1x32x64xf32> to vector<32x64xf32>
    %cst_48 = arith.constant dense<0.000000e+00> : vector<16x64xf32>
    %65 = tpu.matmul %23, %64, %cst_48 {dimension_numbers = #tpu.dot_dimension_numbers<[1], [0], [0], [1], [0, 0, 1, 1], [], []>} : vector<16x32xf32>, vector<32x64xf32>, vector<16x64xf32> -> vector<16x64xf32>
    %66 = vector.shape_cast %65 : vector<16x64xf32> to vector<2x8x64xf32>
    %c2_49 = arith.constant 2 : index
    %c0_50 = arith.constant 0 : index
    %c0_51 = arith.constant 0 : index
    %67 = vector.load %arg5[%c2_49, %c0_50, %c0_51] : memref<8x32x64xf32, #tpu.memory_space<vmem>>, vector<1x32x64xf32>
    %68 = vector.shape_cast %67 : vector<1x32x64xf32> to vector<32x64xf32>
    %cst_52 = arith.constant dense<0.000000e+00> : vector<16x64xf32>
    %69 = tpu.matmul %23, %68, %cst_52 {dimension_numbers = #tpu.dot_dimension_numbers<[1], [0], [0], [1], [0, 0, 1, 1], [], []>} : vector<16x32xf32>, vector<32x64xf32>, vector<16x64xf32> -> vector<16x64xf32>
    %70 = vector.shape_cast %69 : vector<16x64xf32> to vector<2x8x64xf32>
    %c2_53 = arith.constant 2 : index
    %c0_54 = arith.constant 0 : index
    %c0_55 = arith.constant 0 : index
    %71 = vector.load %arg6[%c2_53, %c0_54, %c0_55] : memref<8x32x64xf32, #tpu.memory_space<vmem>>, vector<1x32x64xf32>
    %72 = vector.shape_cast %71 : vector<1x32x64xf32> to vector<32x64xf32>
    %cst_56 = arith.constant dense<0.000000e+00> : vector<16x64xf32>
    %73 = tpu.matmul %23, %72, %cst_56 {dimension_numbers = #tpu.dot_dimension_numbers<[1], [0], [0], [1], [0, 0, 1, 1], [], []>} : vector<16x32xf32>, vector<32x64xf32>, vector<16x64xf32> -> vector<16x64xf32>
    %74 = vector.shape_cast %73 : vector<16x64xf32> to vector<2x8x64xf32>
    "tpu.trace_start"() <{level = 10 : i32, message = "bnd,bmd->bnm"}> : () -> ()
    %cst_57 = arith.constant dense<0.000000e+00> : vector<2x8x8xf32>
    %75 = tpu.matmul %66, %70, %cst_57 {dimension_numbers = #tpu.dot_dimension_numbers<[2], [2], [1], [1], [0, 0, 0, 1, 1, 1], [0], [0]>} : vector<2x8x64xf32>, vector<2x8x64xf32>, vector<2x8x8xf32> -> vector<2x8x8xf32>
    "tpu.trace_stop"() : () -> ()
    "tpu.trace_start"() <{level = 10 : i32, message = "bnm,bmd->bnd"}> : () -> ()
    %cst_58 = arith.constant dense<0.000000e+00> : vector<2x8x64xf32>
    %76 = tpu.matmul %75, %74, %cst_58 {dimension_numbers = #tpu.dot_dimension_numbers<[2], [1], [1], [2], [0, 0, 0, 1, 1, 2], [0], [0]>} : vector<2x8x8xf32>, vector<2x8x64xf32>, vector<2x8x64xf32> -> vector<2x8x64xf32>
    "tpu.trace_stop"() : () -> ()
    %77 = vector.shape_cast %76 : vector<2x8x64xf32> to vector<16x64xf32>
    %c2_59 = arith.constant 2 : index
    %c0_60 = arith.constant 0 : index
    %c0_61 = arith.constant 0 : index
    %78 = vector.load %arg7[%c2_59, %c0_60, %c0_61] : memref<8x64x32xf32, #tpu.memory_space<vmem>>, vector<1x64x32xf32>
    %79 = vector.shape_cast %78 : vector<1x64x32xf32> to vector<64x32xf32>
    %cst_62 = arith.constant dense<0.000000e+00> : vector<16x32xf32>
    %80 = tpu.matmul %77, %79, %cst_62 {dimension_numbers = #tpu.dot_dimension_numbers<[1], [0], [0], [1], [0, 0, 1, 1], [], []>} : vector<16x64xf32>, vector<64x32xf32>, vector<16x32xf32> -> vector<16x32xf32>
    %81 = arith.addf %62, %80 : vector<16x32xf32>
    %c3 = arith.constant 3 : index
    %c0_63 = arith.constant 0 : index
    %c0_64 = arith.constant 0 : index
    %82 = vector.load %arg4[%c3, %c0_63, %c0_64] : memref<8x32x64xf32, #tpu.memory_space<vmem>>, vector<1x32x64xf32>
    %83 = vector.shape_cast %82 : vector<1x32x64xf32> to vector<32x64xf32>
    %cst_65 = arith.constant dense<0.000000e+00> : vector<16x64xf32>
    %84 = tpu.matmul %23, %83, %cst_65 {dimension_numbers = #tpu.dot_dimension_numbers<[1], [0], [0], [1], [0, 0, 1, 1], [], []>} : vector<16x32xf32>, vector<32x64xf32>, vector<16x64xf32> -> vector<16x64xf32>
    %85 = vector.shape_cast %84 : vector<16x64xf32> to vector<2x8x64xf32>
    %c3_66 = arith.constant 3 : index
    %c0_67 = arith.constant 0 : index
    %c0_68 = arith.constant 0 : index
    %86 = vector.load %arg5[%c3_66, %c0_67, %c0_68] : memref<8x32x64xf32, #tpu.memory_space<vmem>>, vector<1x32x64xf32>
    %87 = vector.shape_cast %86 : vector<1x32x64xf32> to vector<32x64xf32>
    %cst_69 = arith.constant dense<0.000000e+00> : vector<16x64xf32>
    %88 = tpu.matmul %23, %87, %cst_69 {dimension_numbers = #tpu.dot_dimension_numbers<[1], [0], [0], [1], [0, 0, 1, 1], [], []>} : vector<16x32xf32>, vector<32x64xf32>, vector<16x64xf32> -> vector<16x64xf32>
    %89 = vector.shape_cast %88 : vector<16x64xf32> to vector<2x8x64xf32>
    %c3_70 = arith.constant 3 : index
    %c0_71 = arith.constant 0 : index
    %c0_72 = arith.constant 0 : index
    %90 = vector.load %arg6[%c3_70, %c0_71, %c0_72] : memref<8x32x64xf32, #tpu.memory_space<vmem>>, vector<1x32x64xf32>
    %91 = vector.shape_cast %90 : vector<1x32x64xf32> to vector<32x64xf32>
    %cst_73 = arith.constant dense<0.000000e+00> : vector<16x64xf32>
    %92 = tpu.matmul %23, %91, %cst_73 {dimension_numbers = #tpu.dot_dimension_numbers<[1], [0], [0], [1], [0, 0, 1, 1], [], []>} : vector<16x32xf32>, vector<32x64xf32>, vector<16x64xf32> -> vector<16x64xf32>
    %93 = vector.shape_cast %92 : vector<16x64xf32> to vector<2x8x64xf32>
    "tpu.trace_start"() <{level = 10 : i32, message = "bnd,bmd->bnm"}> : () -> ()
    %cst_74 = arith.constant dense<0.000000e+00> : vector<2x8x8xf32>
    %94 = tpu.matmul %85, %89, %cst_74 {dimension_numbers = #tpu.dot_dimension_numbers<[2], [2], [1], [1], [0, 0, 0, 1, 1, 1], [0], [0]>} : vector<2x8x64xf32>, vector<2x8x64xf32>, vector<2x8x8xf32> -> vector<2x8x8xf32>
    "tpu.trace_stop"() : () -> ()
    "tpu.trace_start"() <{level = 10 : i32, message = "bnm,bmd->bnd"}> : () -> ()
    %cst_75 = arith.constant dense<0.000000e+00> : vector<2x8x64xf32>
    %95 = tpu.matmul %94, %93, %cst_75 {dimension_numbers = #tpu.dot_dimension_numbers<[2], [1], [1], [2], [0, 0, 0, 1, 1, 2], [0], [0]>} : vector<2x8x8xf32>, vector<2x8x64xf32>, vector<2x8x64xf32> -> vector<2x8x64xf32>
    "tpu.trace_stop"() : () -> ()
    %96 = vector.shape_cast %95 : vector<2x8x64xf32> to vector<16x64xf32>
    %c3_76 = arith.constant 3 : index
    %c0_77 = arith.constant 0 : index
    %c0_78 = arith.constant 0 : index
    %97 = vector.load %arg7[%c3_76, %c0_77, %c0_78] : memref<8x64x32xf32, #tpu.memory_space<vmem>>, vector<1x64x32xf32>
    %98 = vector.shape_cast %97 : vector<1x64x32xf32> to vector<64x32xf32>
    %cst_79 = arith.constant dense<0.000000e+00> : vector<16x32xf32>
    %99 = tpu.matmul %96, %98, %cst_79 {dimension_numbers = #tpu.dot_dimension_numbers<[1], [0], [0], [1], [0, 0, 1, 1], [], []>} : vector<16x64xf32>, vector<64x32xf32>, vector<16x32xf32> -> vector<16x32xf32>
    %100 = arith.addf %81, %99 : vector<16x32xf32>
    %c4 = arith.constant 4 : index
    %c0_80 = arith.constant 0 : index
    %c0_81 = arith.constant 0 : index
    %101 = vector.load %arg4[%c4, %c0_80, %c0_81] : memref<8x32x64xf32, #tpu.memory_space<vmem>>, vector<1x32x64xf32>
    %102 = vector.shape_cast %101 : vector<1x32x64xf32> to vector<32x64xf32>
    %cst_82 = arith.constant dense<0.000000e+00> : vector<16x64xf32>
    %103 = tpu.matmul %23, %102, %cst_82 {dimension_numbers = #tpu.dot_dimension_numbers<[1], [0], [0], [1], [0, 0, 1, 1], [], []>} : vector<16x32xf32>, vector<32x64xf32>, vector<16x64xf32> -> vector<16x64xf32>
    %104 = vector.shape_cast %103 : vector<16x64xf32> to vector<2x8x64xf32>
    %c4_83 = arith.constant 4 : index
    %c0_84 = arith.constant 0 : index
    %c0_85 = arith.constant 0 : index
    %105 = vector.load %arg5[%c4_83, %c0_84, %c0_85] : memref<8x32x64xf32, #tpu.memory_space<vmem>>, vector<1x32x64xf32>
    %106 = vector.shape_cast %105 : vector<1x32x64xf32> to vector<32x64xf32>
    %cst_86 = arith.constant dense<0.000000e+00> : vector<16x64xf32>
    %107 = tpu.matmul %23, %106, %cst_86 {dimension_numbers = #tpu.dot_dimension_numbers<[1], [0], [0], [1], [0, 0, 1, 1], [], []>} : vector<16x32xf32>, vector<32x64xf32>, vector<16x64xf32> -> vector<16x64xf32>
    %108 = vector.shape_cast %107 : vector<16x64xf32> to vector<2x8x64xf32>
    %c4_87 = arith.constant 4 : index
    %c0_88 = arith.constant 0 : index
    %c0_89 = arith.constant 0 : index
    %109 = vector.load %arg6[%c4_87, %c0_88, %c0_89] : memref<8x32x64xf32, #tpu.memory_space<vmem>>, vector<1x32x64xf32>
    %110 = vector.shape_cast %109 : vector<1x32x64xf32> to vector<32x64xf32>
    %cst_90 = arith.constant dense<0.000000e+00> : vector<16x64xf32>
    %111 = tpu.matmul %23, %110, %cst_90 {dimension_numbers = #tpu.dot_dimension_numbers<[1], [0], [0], [1], [0, 0, 1, 1], [], []>} : vector<16x32xf32>, vector<32x64xf32>, vector<16x64xf32> -> vector<16x64xf32>
    %112 = vector.shape_cast %111 : vector<16x64xf32> to vector<2x8x64xf32>
    "tpu.trace_start"() <{level = 10 : i32, message = "bnd,bmd->bnm"}> : () -> ()
    %cst_91 = arith.constant dense<0.000000e+00> : vector<2x8x8xf32>
    %113 = tpu.matmul %104, %108, %cst_91 {dimension_numbers = #tpu.dot_dimension_numbers<[2], [2], [1], [1], [0, 0, 0, 1, 1, 1], [0], [0]>} : vector<2x8x64xf32>, vector<2x8x64xf32>, vector<2x8x8xf32> -> vector<2x8x8xf32>
    "tpu.trace_stop"() : () -> ()
    "tpu.trace_start"() <{level = 10 : i32, message = "bnm,bmd->bnd"}> : () -> ()
    %cst_92 = arith.constant dense<0.000000e+00> : vector<2x8x64xf32>
    %114 = tpu.matmul %113, %112, %cst_92 {dimension_numbers = #tpu.dot_dimension_numbers<[2], [1], [1], [2], [0, 0, 0, 1, 1, 2], [0], [0]>} : vector<2x8x8xf32>, vector<2x8x64xf32>, vector<2x8x64xf32> -> vector<2x8x64xf32>
    "tpu.trace_stop"() : () -> ()
    %115 = vector.shape_cast %114 : vector<2x8x64xf32> to vector<16x64xf32>
    %c4_93 = arith.constant 4 : index
    %c0_94 = arith.constant 0 : index
    %c0_95 = arith.constant 0 : index
    %116 = vector.load %arg7[%c4_93, %c0_94, %c0_95] : memref<8x64x32xf32, #tpu.memory_space<vmem>>, vector<1x64x32xf32>
    %117 = vector.shape_cast %116 : vector<1x64x32xf32> to vector<64x32xf32>
    %cst_96 = arith.constant dense<0.000000e+00> : vector<16x32xf32>
    %118 = tpu.matmul %115, %117, %cst_96 {dimension_numbers = #tpu.dot_dimension_numbers<[1], [0], [0], [1], [0, 0, 1, 1], [], []>} : vector<16x64xf32>, vector<64x32xf32>, vector<16x32xf32> -> vector<16x32xf32>
    %119 = arith.addf %100, %118 : vector<16x32xf32>
    %c5 = arith.constant 5 : index
    %c0_97 = arith.constant 0 : index
    %c0_98 = arith.constant 0 : index
    %120 = vector.load %arg4[%c5, %c0_97, %c0_98] : memref<8x32x64xf32, #tpu.memory_space<vmem>>, vector<1x32x64xf32>
    %121 = vector.shape_cast %120 : vector<1x32x64xf32> to vector<32x64xf32>
    %cst_99 = arith.constant dense<0.000000e+00> : vector<16x64xf32>
    %122 = tpu.matmul %23, %121, %cst_99 {dimension_numbers = #tpu.dot_dimension_numbers<[1], [0], [0], [1], [0, 0, 1, 1], [], []>} : vector<16x32xf32>, vector<32x64xf32>, vector<16x64xf32> -> vector<16x64xf32>
    %123 = vector.shape_cast %122 : vector<16x64xf32> to vector<2x8x64xf32>
    %c5_100 = arith.constant 5 : index
    %c0_101 = arith.constant 0 : index
    %c0_102 = arith.constant 0 : index
    %124 = vector.load %arg5[%c5_100, %c0_101, %c0_102] : memref<8x32x64xf32, #tpu.memory_space<vmem>>, vector<1x32x64xf32>
    %125 = vector.shape_cast %124 : vector<1x32x64xf32> to vector<32x64xf32>
    %cst_103 = arith.constant dense<0.000000e+00> : vector<16x64xf32>
    %126 = tpu.matmul %23, %125, %cst_103 {dimension_numbers = #tpu.dot_dimension_numbers<[1], [0], [0], [1], [0, 0, 1, 1], [], []>} : vector<16x32xf32>, vector<32x64xf32>, vector<16x64xf32> -> vector<16x64xf32>
    %127 = vector.shape_cast %126 : vector<16x64xf32> to vector<2x8x64xf32>
    %c5_104 = arith.constant 5 : index
    %c0_105 = arith.constant 0 : index
    %c0_106 = arith.constant 0 : index
    %128 = vector.load %arg6[%c5_104, %c0_105, %c0_106] : memref<8x32x64xf32, #tpu.memory_space<vmem>>, vector<1x32x64xf32>
    %129 = vector.shape_cast %128 : vector<1x32x64xf32> to vector<32x64xf32>
    %cst_107 = arith.constant dense<0.000000e+00> : vector<16x64xf32>
    %130 = tpu.matmul %23, %129, %cst_107 {dimension_numbers = #tpu.dot_dimension_numbers<[1], [0], [0], [1], [0, 0, 1, 1], [], []>} : vector<16x32xf32>, vector<32x64xf32>, vector<16x64xf32> -> vector<16x64xf32>
    %131 = vector.shape_cast %130 : vector<16x64xf32> to vector<2x8x64xf32>
    "tpu.trace_start"() <{level = 10 : i32, message = "bnd,bmd->bnm"}> : () -> ()
    %cst_108 = arith.constant dense<0.000000e+00> : vector<2x8x8xf32>
    %132 = tpu.matmul %123, %127, %cst_108 {dimension_numbers = #tpu.dot_dimension_numbers<[2], [2], [1], [1], [0, 0, 0, 1, 1, 1], [0], [0]>} : vector<2x8x64xf32>, vector<2x8x64xf32>, vector<2x8x8xf32> -> vector<2x8x8xf32>
    "tpu.trace_stop"() : () -> ()
    "tpu.trace_start"() <{level = 10 : i32, message = "bnm,bmd->bnd"}> : () -> ()
    %cst_109 = arith.constant dense<0.000000e+00> : vector<2x8x64xf32>
    %133 = tpu.matmul %132, %131, %cst_109 {dimension_numbers = #tpu.dot_dimension_numbers<[2], [1], [1], [2], [0, 0, 0, 1, 1, 2], [0], [0]>} : vector<2x8x8xf32>, vector<2x8x64xf32>, vector<2x8x64xf32> -> vector<2x8x64xf32>
    "tpu.trace_stop"() : () -> ()
    %134 = vector.shape_cast %133 : vector<2x8x64xf32> to vector<16x64xf32>
    %c5_110 = arith.constant 5 : index
    %c0_111 = arith.constant 0 : index
    %c0_112 = arith.constant 0 : index
    %135 = vector.load %arg7[%c5_110, %c0_111, %c0_112] : memref<8x64x32xf32, #tpu.memory_space<vmem>>, vector<1x64x32xf32>
    %136 = vector.shape_cast %135 : vector<1x64x32xf32> to vector<64x32xf32>
    %cst_113 = arith.constant dense<0.000000e+00> : vector<16x32xf32>
    %137 = tpu.matmul %134, %136, %cst_113 {dimension_numbers = #tpu.dot_dimension_numbers<[1], [0], [0], [1], [0, 0, 1, 1], [], []>} : vector<16x64xf32>, vector<64x32xf32>, vector<16x32xf32> -> vector<16x32xf32>
    %138 = arith.addf %119, %137 : vector<16x32xf32>
    %c6 = arith.constant 6 : index
    %c0_114 = arith.constant 0 : index
    %c0_115 = arith.constant 0 : index
    %139 = vector.load %arg4[%c6, %c0_114, %c0_115] : memref<8x32x64xf32, #tpu.memory_space<vmem>>, vector<1x32x64xf32>
    %140 = vector.shape_cast %139 : vector<1x32x64xf32> to vector<32x64xf32>
    %cst_116 = arith.constant dense<0.000000e+00> : vector<16x64xf32>
    %141 = tpu.matmul %23, %140, %cst_116 {dimension_numbers = #tpu.dot_dimension_numbers<[1], [0], [0], [1], [0, 0, 1, 1], [], []>} : vector<16x32xf32>, vector<32x64xf32>, vector<16x64xf32> -> vector<16x64xf32>
    %142 = vector.shape_cast %141 : vector<16x64xf32> to vector<2x8x64xf32>
    %c6_117 = arith.constant 6 : index
    %c0_118 = arith.constant 0 : index
    %c0_119 = arith.constant 0 : index
    %143 = vector.load %arg5[%c6_117, %c0_118, %c0_119] : memref<8x32x64xf32, #tpu.memory_space<vmem>>, vector<1x32x64xf32>
    %144 = vector.shape_cast %143 : vector<1x32x64xf32> to vector<32x64xf32>
    %cst_120 = arith.constant dense<0.000000e+00> : vector<16x64xf32>
    %145 = tpu.matmul %23, %144, %cst_120 {dimension_numbers = #tpu.dot_dimension_numbers<[1], [0], [0], [1], [0, 0, 1, 1], [], []>} : vector<16x32xf32>, vector<32x64xf32>, vector<16x64xf32> -> vector<16x64xf32>
    %146 = vector.shape_cast %145 : vector<16x64xf32> to vector<2x8x64xf32>
    %c6_121 = arith.constant 6 : index
    %c0_122 = arith.constant 0 : index
    %c0_123 = arith.constant 0 : index
    %147 = vector.load %arg6[%c6_121, %c0_122, %c0_123] : memref<8x32x64xf32, #tpu.memory_space<vmem>>, vector<1x32x64xf32>
    %148 = vector.shape_cast %147 : vector<1x32x64xf32> to vector<32x64xf32>
    %cst_124 = arith.constant dense<0.000000e+00> : vector<16x64xf32>
    %149 = tpu.matmul %23, %148, %cst_124 {dimension_numbers = #tpu.dot_dimension_numbers<[1], [0], [0], [1], [0, 0, 1, 1], [], []>} : vector<16x32xf32>, vector<32x64xf32>, vector<16x64xf32> -> vector<16x64xf32>
    %150 = vector.shape_cast %149 : vector<16x64xf32> to vector<2x8x64xf32>
    "tpu.trace_start"() <{level = 10 : i32, message = "bnd,bmd->bnm"}> : () -> ()
    %cst_125 = arith.constant dense<0.000000e+00> : vector<2x8x8xf32>
    %151 = tpu.matmul %142, %146, %cst_125 {dimension_numbers = #tpu.dot_dimension_numbers<[2], [2], [1], [1], [0, 0, 0, 1, 1, 1], [0], [0]>} : vector<2x8x64xf32>, vector<2x8x64xf32>, vector<2x8x8xf32> -> vector<2x8x8xf32>
    "tpu.trace_stop"() : () -> ()
    "tpu.trace_start"() <{level = 10 : i32, message = "bnm,bmd->bnd"}> : () -> ()
    %cst_126 = arith.constant dense<0.000000e+00> : vector<2x8x64xf32>
    %152 = tpu.matmul %151, %150, %cst_126 {dimension_numbers = #tpu.dot_dimension_numbers<[2], [1], [1], [2], [0, 0, 0, 1, 1, 2], [0], [0]>} : vector<2x8x8xf32>, vector<2x8x64xf32>, vector<2x8x64xf32> -> vector<2x8x64xf32>
    "tpu.trace_stop"() : () -> ()
    %153 = vector.shape_cast %152 : vector<2x8x64xf32> to vector<16x64xf32>
    %c6_127 = arith.constant 6 : index
    %c0_128 = arith.constant 0 : index
    %c0_129 = arith.constant 0 : index
    %154 = vector.load %arg7[%c6_127, %c0_128, %c0_129] : memref<8x64x32xf32, #tpu.memory_space<vmem>>, vector<1x64x32xf32>
    %155 = vector.shape_cast %154 : vector<1x64x32xf32> to vector<64x32xf32>
    %cst_130 = arith.constant dense<0.000000e+00> : vector<16x32xf32>
    %156 = tpu.matmul %153, %155, %cst_130 {dimension_numbers = #tpu.dot_dimension_numbers<[1], [0], [0], [1], [0, 0, 1, 1], [], []>} : vector<16x64xf32>, vector<64x32xf32>, vector<16x32xf32> -> vector<16x32xf32>
    %157 = arith.addf %138, %156 : vector<16x32xf32>
    %c7 = arith.constant 7 : index
    %c0_131 = arith.constant 0 : index
    %c0_132 = arith.constant 0 : index
    %158 = vector.load %arg4[%c7, %c0_131, %c0_132] : memref<8x32x64xf32, #tpu.memory_space<vmem>>, vector<1x32x64xf32>
    %159 = vector.shape_cast %158 : vector<1x32x64xf32> to vector<32x64xf32>
    %cst_133 = arith.constant dense<0.000000e+00> : vector<16x64xf32>
    %160 = tpu.matmul %23, %159, %cst_133 {dimension_numbers = #tpu.dot_dimension_numbers<[1], [0], [0], [1], [0, 0, 1, 1], [], []>} : vector<16x32xf32>, vector<32x64xf32>, vector<16x64xf32> -> vector<16x64xf32>
    %161 = vector.shape_cast %160 : vector<16x64xf32> to vector<2x8x64xf32>
    %c7_134 = arith.constant 7 : index
    %c0_135 = arith.constant 0 : index
    %c0_136 = arith.constant 0 : index
    %162 = vector.load %arg5[%c7_134, %c0_135, %c0_136] : memref<8x32x64xf32, #tpu.memory_space<vmem>>, vector<1x32x64xf32>
    %163 = vector.shape_cast %162 : vector<1x32x64xf32> to vector<32x64xf32>
    %cst_137 = arith.constant dense<0.000000e+00> : vector<16x64xf32>
    %164 = tpu.matmul %23, %163, %cst_137 {dimension_numbers = #tpu.dot_dimension_numbers<[1], [0], [0], [1], [0, 0, 1, 1], [], []>} : vector<16x32xf32>, vector<32x64xf32>, vector<16x64xf32> -> vector<16x64xf32>
    %165 = vector.shape_cast %164 : vector<16x64xf32> to vector<2x8x64xf32>
    %c7_138 = arith.constant 7 : index
    %c0_139 = arith.constant 0 : index
    %c0_140 = arith.constant 0 : index
    %166 = vector.load %arg6[%c7_138, %c0_139, %c0_140] : memref<8x32x64xf32, #tpu.memory_space<vmem>>, vector<1x32x64xf32>
    %167 = vector.shape_cast %166 : vector<1x32x64xf32> to vector<32x64xf32>
    %cst_141 = arith.constant dense<0.000000e+00> : vector<16x64xf32>
    %168 = tpu.matmul %23, %167, %cst_141 {dimension_numbers = #tpu.dot_dimension_numbers<[1], [0], [0], [1], [0, 0, 1, 1], [], []>} : vector<16x32xf32>, vector<32x64xf32>, vector<16x64xf32> -> vector<16x64xf32>
    %169 = vector.shape_cast %168 : vector<16x64xf32> to vector<2x8x64xf32>
    "tpu.trace_start"() <{level = 10 : i32, message = "bnd,bmd->bnm"}> : () -> ()
    %cst_142 = arith.constant dense<0.000000e+00> : vector<2x8x8xf32>
    %170 = tpu.matmul %161, %165, %cst_142 {dimension_numbers = #tpu.dot_dimension_numbers<[2], [2], [1], [1], [0, 0, 0, 1, 1, 1], [0], [0]>} : vector<2x8x64xf32>, vector<2x8x64xf32>, vector<2x8x8xf32> -> vector<2x8x8xf32>
    "tpu.trace_stop"() : () -> ()
    "tpu.trace_start"() <{level = 10 : i32, message = "bnm,bmd->bnd"}> : () -> ()
    %cst_143 = arith.constant dense<0.000000e+00> : vector<2x8x64xf32>
    %171 = tpu.matmul %170, %169, %cst_143 {dimension_numbers = #tpu.dot_dimension_numbers<[2], [1], [1], [2], [0, 0, 0, 1, 1, 2], [0], [0]>} : vector<2x8x8xf32>, vector<2x8x64xf32>, vector<2x8x64xf32> -> vector<2x8x64xf32>
    "tpu.trace_stop"() : () -> ()
    %172 = vector.shape_cast %171 : vector<2x8x64xf32> to vector<16x64xf32>
    %c7_144 = arith.constant 7 : index
    %c0_145 = arith.constant 0 : index
    %c0_146 = arith.constant 0 : index
    %173 = vector.load %arg7[%c7_144, %c0_145, %c0_146] : memref<8x64x32xf32, #tpu.memory_space<vmem>>, vector<1x64x32xf32>
    %174 = vector.shape_cast %173 : vector<1x64x32xf32> to vector<64x32xf32>
    %cst_147 = arith.constant dense<0.000000e+00> : vector<16x32xf32>
    %175 = tpu.matmul %172, %174, %cst_147 {dimension_numbers = #tpu.dot_dimension_numbers<[1], [0], [0], [1], [0, 0, 1, 1], [], []>} : vector<16x64xf32>, vector<64x32xf32>, vector<16x32xf32> -> vector<16x32xf32>
    %176 = arith.addf %157, %175 : vector<16x32xf32>
    %c0_148 = arith.constant 0 : index
    %c0_149 = arith.constant 0 : index
    %177 = vector.load %arg8[%c0_148, %c0_149] : memref<1x32xf32, #tpu.memory_space<vmem>>, vector<1x32xf32>
    %178 = vector.broadcast %177 : vector<1x32xf32> to vector<16x32xf32>
    %179 = arith.addf %176, %178 : vector<16x32xf32>
    %180 = vector.shape_cast %179 : vector<16x32xf32> to vector<2x8x32xf32>
    %c0_150 = arith.constant 0 : index
    %c0_151 = arith.constant 0 : index
    %c0_152 = arith.constant 0 : index
    %181 = vector.load %arg9[%c0_150, %c0_151, %c0_152] : memref<2x8x32xf32, #tpu.memory_space<vmem>>, vector<2x8x32xf32>
    tpu.vector_store %arg9[%c0_150, %c0_151, %c0_152], %180 {strides = array<i32>} : memref<2x8x32xf32, #tpu.memory_space<vmem>>, vector<2x8x32xf32>,
    return
  }
  func.func @transform_0(%arg0: i32) -> (i32, i32, i32) {
    %c0_i32 = arith.constant 0 : i32
    %c0_i32_0 = arith.constant 0 : i32
    %c0_i32_1 = arith.constant 0 : i32
    return %arg0, %c0_i32, %c0_i32_0 : i32, i32, i32
  }
  func.func @transform_1(%arg0: i32) -> (i32, i32) {
    %c0_i32 = arith.constant 0 : i32
    %c0_i32_0 = arith.constant 0 : i32
    %c0_i32_1 = arith.constant 0 : i32
    return %c0_i32, %c0_i32_0 : i32, i32
  }
  func.func @transform_2(%arg0: i32) -> (i32, i32) {
    %c0_i32 = arith.constant 0 : i32
    %c0_i32_0 = arith.constant 0 : i32
    %c0_i32_1 = arith.constant 0 : i32
    return %c0_i32, %c0_i32_0 : i32, i32
  }
  func.func @transform_3(%arg0: i32) -> (i32, i32, i32) {
    %c0_i32 = arith.constant 0 : i32
    %c0_i32_0 = arith.constant 0 : i32
    %c0_i32_1 = arith.constant 0 : i32
    %c0_i32_2 = arith.constant 0 : i32
    return %c0_i32, %c0_i32_0, %c0_i32_1 : i32, i32, i32
  }
  func.func @transform_4(%arg0: i32) -> (i32, i32, i32) {
    %c0_i32 = arith.constant 0 : i32
    %c0_i32_0 = arith.constant 0 : i32
    %c0_i32_1 = arith.constant 0 : i32
    %c0_i32_2 = arith.constant 0 : i32
    return %c0_i32, %c0_i32_0, %c0_i32_1 : i32, i32, i32
  }
  func.func @transform_5(%arg0: i32) -> (i32, i32, i32) {
    %c0_i32 = arith.constant 0 : i32
    %c0_i32_0 = arith.constant 0 : i32
    %c0_i32_1 = arith.constant 0 : i32
    %c0_i32_2 = arith.constant 0 : i32
    return %c0_i32, %c0_i32_0, %c0_i32_1 : i32, i32, i32
  }
  func.func @transform_6(%arg0: i32) -> (i32, i32, i32) {
    %c0_i32 = arith.constant 0 : i32
    %c0_i32_0 = arith.constant 0 : i32
    %c0_i32_1 = arith.constant 0 : i32
    %c0_i32_2 = arith.constant 0 : i32
    return %c0_i32, %c0_i32_0, %c0_i32_1 : i32, i32, i32
  }
  func.func @transform_7(%arg0: i32) -> (i32, i32) {
    %c0_i32 = arith.constant 0 : i32
    %c0_i32_0 = arith.constant 0 : i32
    %c0_i32_1 = arith.constant 0 : i32
    return %c0_i32, %c0_i32_0 : i32, i32
  }
  func.func @transform_8(%arg0: i32) -> (i32, i32, i32) {
    %c0_i32 = arith.constant 0 : i32
    %c0_i32_0 = arith.constant 0 : i32
    %c0_i32_1 = arith.constant 0 : i32
    return %arg0, %c0_i32, %c0_i32_0 : i32, i32, i32
  }
}

</mosaic_0001>

<bundles_post_ra>
// kernel: tpu_custom_call.1
= control target key start
LH: loop header
LB: loop body
LE: loop exit
PB: predicated region body
PF: predicated region fallthrough
CT: control target
= control target key end

     0   :  { %13 = vsyncpa [#allocation3], 0  ;;  %s7260_s0 = inlined_call_operand.hbm [shape: f32[2,8,32], index: 0, kind: input, shape index: {}]   ;;  %s7261_s1 = inlined_call_operand.hbm [shape: f32[1,32], index: 1, kind: input, shape index: {}]   ;;  %s7262_s2 = inlined_call_operand.hbm [shape: f32[1,32], index: 2, kind: input, shape index: {}]   ;;  %s7263_s3 = inlined_call_operand.vmem [shape: f32[8,32,64], index: 3, kind: input, shape index: {}]   ;;  %s7264_s4 = inlined_call_operand.vmem [shape: f32[8,32,64], index: 4, kind: input, shape index: {}]   ;;  %s7265_s5 = inlined_call_operand.vmem [shape: f32[8,32,64], index: 5, kind: input, shape index: {}]   ;;  %s7266_s6 = inlined_call_operand.vmem [shape: f32[8,64,32], index: 6, kind: input, shape index: {}]   ;;  %s7267_s7 = inlined_call_operand.vmem [shape: f32[1,32], index: 7, kind: input, shape index: {}]   ;;  %s7268_s8 = inlined_call_operand.hbm [shape: f32[2,8,32], index: 8, kind: output, shape index: {}]  }
   0x1   :  { %14 = vsyncpa [#allocation6], 0 }
   0x2   :  { %15 = vsyncpa [#allocation4], 0  ;;  %s6401_s27 = smov [#allocation5]   ;;  %s6402_s29 = smov [#allocation2]  }
   0x3   :  { %s34_s28 = sshll.u32 %s6401_s27, 4  ;;  %s21_s30 = sshll.u32 %s6402_s29, 4  ;;  %s35_s28 = int_to_ptr.vmem [resolvable:$true] %s34_s28  ;;  %s22_s30 = int_to_ptr.vmem [resolvable:$true] %s21_s30 }
   0x4   :  { %s6323_s9 = scalar_lea.vmem %s35_s28, 16  ;;  %s6327_s10 = scalar_lea.vmem %s35_s28, 32 }
   0x5   :  { %p6324_p0 = scmp.ne.s32.totalorder %s35_s28, %s6323_s9  ;;  %p6328_p1 = scmp.lt.s32.totalorder %s35_s28, %s35_s28 }
   0x6   :  { %p6329_p2 = scmp.lt.s32.totalorder %s6327_s10, %s6323_s9 }
   0x8   :  { %p6330_p3 = por %p6329_p2, %p6328_p1 }
   0xa   :  { %p6331_p4 = pnand %p6330_p3, %p6324_p0 }
   0xc   :  { %6334 = shalt.err (!%p6331_p4)
}
   0xd   :  { %37 = dma.hbm_to_vmem [thread:$0]  %s7261_s1, 16, %s35_s28, [#allocation6]  }
   0xe   :  { %s6343_s13 = scalar_lea.vmem %s22_s30, 256  ;;  %p6348_p6 = scmp.lt.s32.totalorder %s22_s30, %s22_s30 }
   0xf   :  { %p6344_p5 = scmp.ne.s32.totalorder %s22_s30, %s6343_s13  ;;  %p6349_p7 = scmp.lt.s32.totalorder %s6343_s13, %s6343_s13 }
  0x11   :  { %p6350_p8 = por %p6349_p7, %p6348_p6 }
  0x13   :  { %p6351_p9 = pnand %p6350_p8, %p6344_p5 }
  0x15   :  { %6354 = shalt.err (!%p6351_p9)
}
  0x16   :  { %s6403_s14 = smov 128   ;;  %s6404_s15 = smov 8  }
  0x17   :  { %27 = dma.hbm_to_vmem [thread:$0]  %s7260_s0, 256, %s22_s30, [#allocation3], %s6403_s14, %s6403_s14, %s6404_s15  }
  0x18   :  { %s6405_s18 = smov [#allocation7]  }
  0x19   :  { %s44_s19 = sshll.u32 %s6405_s18, 4  ;;  %s45_s19 = int_to_ptr.vmem [resolvable:$true] %s44_s19 }
  0x1a   :  { %s6363_s1 = scalar_lea.vmem %s45_s19, 16  ;;  %s6367_s20 = scalar_lea.vmem %s45_s19, 32 }
  0x1b   :  { %p6364_p10 = scmp.ne.s32.totalorder %s45_s19, %s6363_s1  ;;  %p6368_p11 = scmp.lt.s32.totalorder %s45_s19, %s45_s19 }
  0x1c   :  { %p6369_p12 = scmp.lt.s32.totalorder %s6367_s20, %s6363_s1 }
  0x1e   :  { %p6370_p13 = por %p6369_p12, %p6368_p11 }
  0x20   :  { %p6371_p0 = pnand %p6370_p13, %p6364_p10 }
  0x22   :  { %6374 = shalt.err (!%p6371_p0)
}
  0x23   :  { %47 = dma.hbm_to_vmem [thread:$0]  %s7262_s2, 16, %s45_s19, [#allocation6]  }
  0x24   :  { %6395 = dma.done.wait [#allocation3], 256  }
  0x25   :  { %6396 = vsyncadd [#allocation3], 4294967040 }
  0x26   :  { %6397 = dma.done.wait [#allocation6], 32  }
  0x27   :  { %6398 = vsyncadd [#allocation6], 4294967264  ;;  %vm69_vm0 = vcmask 261120   ;;  %v67_v0 = vld [vmem:[#allocation2] sm:$0xff]  ;;  %v68_v1 = vld [vmem:[#allocation2 + $0x8] sm:$0xff]  ;;  %v6406_v42 = vmov 0.0  }
  0x28   :  { %v70_v2 = vsel %vm69_vm0, %v67_v0, 0.0  ;;  %v73_v3 = vsel %vm69_vm0, %v68_v1, 0.0  ;;  %v118_v14 = vld [vmem:[%s7263_s3 + $0x18] sm:$0xff]  ;;  %v117_v16 = vld [vmem:[%s7263_s3 + $0x10] sm:$0xff]  ;;  %v116_v18 = vld [vmem:[%s7263_s3 + $0x8] sm:$0xff]  ;;  %vm6407_vm1 = vmmov 0  }
  0x29   :  { %71 = vadd.xlane.f32.xlu0 %v70_v2  ;;  %5727 = vmatprep.subr.mxu1 %v118_v14  ;;  %v282_v15 = vld [vmem:[%s7265_s5 + $0x18] sm:$0xff]  ;;  %v281_v17 = vld [vmem:[%s7265_s5 + $0x10] sm:$0xff]  ;;  %v280_v19 = vld [vmem:[%s7265_s5 + $0x8] sm:$0xff]  ;;  %vm358_vm2 = vcmask 523264   ;;  %vm511_vm3 = vcmask 64512   ;;  %s6408_s19 = smov [#allocation8]  }
  0x2a   :  { %5728 = vmatpush3.msra.mxu1 %v118_v14  ;;  %5749 = vmatprep.subr.mxu0 %v282_v15  ;;  %v115_v20 = vld [vmem:[%s7263_s3] sm:$0xff]  ;;  %v203_v22 = vld [vmem:[%s7264_s4 + $0x18] sm:$0xff]  ;;  %v5184_v30 = vld [vmem:[#allocation5] ss:$0 sm:$0xff]  ;;  %s5171_s1 = sshll.u32 %s6408_s19, 4  ;;  %s5172_s1 = int_to_ptr.vmem [resolvable:$true] %s5171_s1 }
  0x2b   :  { %5729 = vmatprep.subr.mxu1 %v117_v16  ;;  %5750 = vmatpush3.msra.mxu0 %v282_v15  ;;  %v279_v21 = vld [vmem:[%s7265_s5] sm:$0xff]  ;;  %v5185_v32 = vld [vmem:[#allocation7] ss:$0 sm:$0xff]  ;;  %v201_v40 = vld [vmem:[%s7264_s4 + $0x8] sm:$0xff]  ;;  %p6380_p2 = scmp.lt.s32.totalorder %s5172_s1, %s5172_s1 }
  0x2c   :  { %5730 = vmatpush3.msra.mxu1 %v117_v16  ;;  %5751 = vmatprep.subr.mxu0 %v281_v17  ;;  %v202_v39 = vld [vmem:[%s7264_s4 + $0x10] sm:$0xff]  ;;  %v200_v41 = vld [vmem:[%s7264_s4] sm:$0xff]  ;;  %v5201_v49 = vld [vmem:[%s7263_s3 + $0x38] sm:$0xff] }
  0x2d   :  { %74 = vadd.xlane.f32.xlu0 %v73_v3  ;;  %5731 = vmatprep.subr.mxu1 %v116_v18  ;;  %v5207_v50 = vld [vmem:[%s7264_s4 + $0x38] sm:$0xff]  ;;  %v5200_v52 = vld [vmem:[%s7263_s3 + $0x30] sm:$0xff]  ;;  %v5199_v54 = vld [vmem:[%s7263_s3 + $0x28] sm:$0xff] }
  0x2e   :  { %5752 = vmatpush3.msra.mxu0 %v281_v17  ;;  %5732 = vmatpush3.msra.mxu1 %v116_v18  ;;  %v5198_v56 = vld [vmem:[%s7263_s3 + $0x20] sm:$0xff]  ;;  %v5206_v57 = vld [vmem:[%s7264_s4 + $0x30] sm:$0xff]  ;;  %v5205_v59 = vld [vmem:[%s7264_s4 + $0x28] sm:$0xff] }
  0x2f   :  { %5753 = vmatprep.subr.mxu0 %v280_v19  ;;  %5733 = vmatprep.subr.mxu1 %v115_v20  ;;  %v5213_v60 = vld [vmem:[%s7265_s5 + $0x38] sm:$0xff]  ;;  %v5204_v61 = vld [vmem:[%s7264_s4 + $0x20] sm:$0xff]  ;;  %v5212_v62 = vld [vmem:[%s7265_s5 + $0x30] sm:$0xff] }
  0x30   :  { %5754 = vmatpush3.msra.mxu0 %v280_v19  ;;  %5734 = vmatpush3.msra.mxu1 %v115_v20  ;;  %v5211_v63 = vld [vmem:[%s7265_s5 + $0x28] sm:$0xff]  ;;  %v5228_v14 = vld [vmem:[%s7266_s6 + $0x70] sm:$0xff]  ;;  %v5226_v19 = vld [vmem:[%s7266_s6 + $0x60] sm:$0xff] }
  0x31   :  { %5755 = vmatprep.subr.mxu0 %v279_v21  ;;  %5738 = vmatprep.subr.mxu1 %v203_v22  ;;  %v5227_v16 = vld [vmem:[%s7266_s6 + $0x68] sm:$0xff]  ;;  %v664_v18 = vld [vmem:[%s7266_s6 + $0x30] sm:$0xff] }
  0x32   :  { %5756 = vmatpush3.msra.mxu0 %v279_v21  ;;  %v663_v21 = vld [vmem:[%s7266_s6 + $0x28] sm:$0xff] }
  0x33   :  { %5770 = vmatprep.subr.mxu0 %v6406_v42 }
  0xb2   :  { %v72_v4 = vpop.xlane.xlu0 %71 }
  0xb3   :  { %v77_v5 = vmul.f32 0.03125, %v72_v4 }
  0xb5   :  { %v79_v6 = vsub.f32 %v67_v0, %v77_v5  ;;  %v5210_v0 = vld [vmem:[%s7265_s5 + $0x20] sm:$0xff] }
  0xb6   :  { %v75_v7 = vpop.xlane.xlu0 %74 }
  0xb7   :  { %v78_v8 = vmul.f32 0.03125, %v75_v7  ;;  %v81_v9 = vmul.f32 %v79_v6, %v79_v6 }
  0xb9   :  { %v80_v10 = vsub.f32 %v68_v1, %v78_v8  ;;  %v83_v11 = vsel %vm69_vm0, %v81_v9, 0.0 }
  0xba   :  { %84 = vadd.xlane.f32.xlu1 %v83_v11  ;;  %v665_v11 = vld [vmem:[%s7266_s6 + $0x38] sm:$0xff] }
  0xbb   :  { %v82_v12 = vmul.f32 %v80_v10, %v80_v10 }
  0xbd   :  { %v86_v13 = vsel %vm69_vm0, %v82_v12, 0.0  ;;  %v5229_v12 = vld [vmem:[%s7266_s6 + $0x78] sm:$0xff] }
  0xbe   :  { %87 = vadd.xlane.f32.xlu1 %v86_v13 }
 0x143   :  { %v85_v23 = vpop.xlane.xlu1 %84 }
 0x144   :  { %v89_v24 = vmul.f32 0.03125, %v85_v23  ;;  %v662_v23 = vld [vmem:[%s7266_s6 + $0x20] sm:$0xff] }
 0x146   :  { %v91_v25 = vadd.f32 1e-05, %v89_v24  ;;  %v5224_v24 = vld [vmem:[%s7266_s6 + $0x50] sm:$0xff] }
 0x147   :  { %v88_v26 = vpop.xlane.xlu1 %87 }
 0x148   :  { %6311 = vrsqrt.f32 %v91_v25  ;;  %v90_v27 = vmul.f32 0.03125, %v88_v26  ;;  %v661_v25 = vld [vmem:[%s7266_s6 + $0x18] sm:$0xff]  ;;  %v660_v26 = vld [vmem:[%s7266_s6 + $0x10] sm:$0xff] }
 0x14a   :  { %v92_v28 = vadd.f32 1e-05, %v90_v27  ;;  %v659_v27 = vld [vmem:[%s7266_s6 + $0x8] sm:$0xff] }
 0x14c   :  { %6313 = vrsqrt.f32 %v92_v28  ;;  %v658_v28 = vld [vmem:[%s7266_s6] sm:$0xff] }
 0x155   :  { %v6312_v29 = vpop.eup %6311 }
 0x156   :  { %v95_v31 = vmul.f32 %v6312_v29, %v79_v6  ;;  %v5243_v29 = vld [vmem:[%s7264_s4 + $0x58] sm:$0xff] }
 0x158   :  { %v104_v33 = vmul.f32 %v5184_v30, %v95_v31  ;;  %v5241_v31 = vld [vmem:[%s7264_s4 + $0x48] sm:$0xff] }
 0x159   :  { %v6314_v34 = vpop.eup %6313 }
 0x15a   :  { %v6497_v35 = vadd.f32 %v5185_v32, %v104_v33  ;;  %v96_v36 = vmul.f32 %v6314_v34, %v80_v10  ;;  %v5223_v33 = vld [vmem:[%s7266_s6 + $0x48] sm:$0xff]  ;;  %v5222_v34 = vld [vmem:[%s7266_s6 + $0x40] sm:$0xff] }
 0x15c   :  { %v105_v37 = vmul.f32 %v5184_v30, %v96_v36  ;;  %5735 = vmatprep.mubr.msk.f32.mxu1 %vm69_vm0, %v6497_v35  ;;  %5757 = vmatprep.mubr.msk.f32.mxu0 %vm69_vm0, %v6497_v35  ;;  %v5242_v30 = vld [vmem:[%s7264_s4 + $0x50] sm:$0xff]  ;;  %v5237_v36 = vld [vmem:[%s7263_s3 + $0x58] sm:$0xff] }
 0x15e   :  { %v6503_v38 = vadd.f32 %v5185_v32, %v105_v37  ;;  %v5240_v32 = vld [vmem:[%s7264_s4 + $0x40] sm:$0xff] }
 0x160   :  { %5736 = vmatmul.mubr.msk.f32.vlgmr.msra.gmra.mxu1 %vm69_vm0, %v6503_v38  ;;  %5758 = vmatmul.mubr.msk.f32.vlgmr.msra.gmra.mxu0 %vm69_vm0, %v6503_v38 }
 0x161   :  { %5739 = vmatpush3.msra.mxu1 %v203_v22  ;;  %5746 = vmatprep.mubr.msk.f32.mxu1 %vm69_vm0, %v6497_v35  ;;  %v5225_v22 = vld [vmem:[%s7266_s6 + $0x58] sm:$0xff] }
 0x162   :  { %5740 = vmatprep.subr.mxu1 %v202_v39  ;;  %5772 = vmatprep.mubr.msk.f32.mxu0 %vm6407_vm1, %v6406_v42 }
 0x163   :  { %5741 = vmatpush3.msra.mxu1 %v202_v39 }
 0x164   :  { %5742 = vmatprep.subr.mxu1 %v201_v40 }
 0x165   :  { %5743 = vmatpush3.msra.mxu1 %v201_v40 }
 0x166   :  { %5744 = vmatprep.subr.mxu1 %v200_v41 }
 0x167   :  { %5745 = vmatpush3.msra.mxu1 %v200_v41  ;;  %v5236_v41 = vld [vmem:[%s7263_s3 + $0x50] sm:$0xff] }
 0x168   :  { %5747 = vmatmul.mubr.msk.f32.vlgmr.msra.gmra.mxu1 %vm69_vm0, %v6503_v38  ;;  %5760 = vmatprep.subr.mxu1 %v6406_v42 }
 0x169   :  { %5762 = vmatprep.mubr.msk.f32.mxu1 %vm6407_vm1, %v6406_v42 }
 0x220   :  { %v5759_v43 = vpop.f32.mrf.mxu0  ;;  %v5737_v44 = vpop.f32.mrf.mxu1 }
 0x222   :  { %v349_v45 = vpop.f32.mrf.mxu0  ;;  %v191_v46 = vpop.f32.mrf.mxu1 }
 0x223   :  { %5771 = vmatpush3.msra.mxu0 %v349_v45  ;;  %v5234_v45 = vld [vmem:[%s7263_s3 + $0x40] sm:$0xff] }
 0x224   :  { %5780 = vmatprep.subr.mxu0 %v5201_v49 }
 0x228   :  { %v5748_v47 = vpop.f32.mrf.mxu1 }
 0x22a   :  { %v270_v48 = vpop.f32.mrf.mxu1 }
 0x22b   :  { %5761 = vmatpush3.xpose.msk.msra.mxu1 %vm358_vm2, %v270_v48  ;;  %v5247_v48 = vld [vmem:[%s7265_s5 + $0x48] sm:$0xff] }
 0x22c   :  { %5765 = vmatprep.subr.mxu1 %v6406_v42 }
 0x22e   :  { %5763 = vmatmul.mubr.msk.f32.vlgmr.msra.gmra.mxu1 %vm358_vm2, %v191_v46  ;;  %v5249_v46 = vld [vmem:[%s7265_s5 + $0x58] sm:$0xff] }
 0x22f   :  { %5766 = vmatpush3.xpose.msk.msra.mxu1 %vm358_vm2, %v5748_v47  ;;  %5767 = vmatprep.mubr.msk.f32.mxu1 %vm6407_vm1, %v6406_v42  ;;  %v5248_v47 = vld [vmem:[%s7265_s5 + $0x50] sm:$0xff] }
 0x230   :  { %5775 = vmatprep.subr.mxu1 %v6406_v42 }
 0x232   :  { %5768 = vmatmul.mubr.msk.f32.vlgmr.msra.gmra.mxu1 %vm358_vm2, %v5737_v44  ;;  %v5235_v44 = vld [vmem:[%s7263_s3 + $0x48] sm:$0xff] }
 0x233   :  { %5776 = vmatpush3.msra.mxu1 %v5759_v43  ;;  %5777 = vmatprep.mubr.msk.f32.mxu1 %vm6407_vm1, %v6406_v42 }
 0x234   :  { %5791 = vmatprep.subr.mxu1 %v5207_v50 }
 0x2ee   :  { %v431_v51 = vpop.f32.mrf.mxu1 }
 0x2ef   :  { %5773 = vmatmul.mubr.msk.f32.vlgmr.msra.gmra.mxu0 %vm511_vm3, %v431_v51 }
 0x2f0   :  { %5781 = vmatpush3.msra.mxu0 %v5201_v49  ;;  %v5764_v53 = vpop.f32.mrf.mxu1  ;;  %5788 = vmatprep.mubr.msk.f32.mxu0 %vm69_vm0, %v6497_v35  ;;  %v5246_v49 = vld [vmem:[%s7265_s5 + $0x40] sm:$0xff] }
 0x2f1   :  { %5782 = vmatprep.subr.mxu0 %v5200_v52 }
 0x2f2   :  { %5783 = vmatpush3.msra.mxu0 %v5200_v52  ;;  %v507_v55 = vpop.f32.mrf.mxu1 }
 0x2f3   :  { %5784 = vmatprep.subr.mxu0 %v5199_v54  ;;  %5778 = vmatmul.mubr.msk.f32.vlgmr.msra.gmra.mxu1 %vm511_vm3, %v507_v55 }
 0x2f4   :  { %5785 = vmatpush3.msra.mxu0 %v5199_v54  ;;  %5792 = vmatpush3.msra.mxu1 %v5207_v50  ;;  %v5769_v58 = vpop.f32.mrf.mxu1 }
 0x2f5   :  { %5786 = vmatprep.subr.mxu0 %v5198_v56  ;;  %5793 = vmatprep.subr.mxu1 %v5206_v57 }
 0x2f6   :  { %5799 = vmatprep.mubr.msk.f32.mxu1 %vm69_vm0, %v6497_v35  ;;  %5787 = vmatpush3.msra.mxu0 %v5198_v56 }
 0x2f7   :  { %5794 = vmatpush3.msra.mxu1 %v5206_v57  ;;  %5789 = vmatmul.mubr.msk.f32.vlgmr.msra.gmra.mxu0 %vm69_vm0, %v6503_v38 }
 0x2f8   :  { %5795 = vmatprep.subr.mxu1 %v5205_v59  ;;  %5802 = vmatprep.subr.mxu0 %v5213_v60 }
 0x2f9   :  { %5796 = vmatpush3.msra.mxu1 %v5205_v59  ;;  %5803 = vmatpush3.msra.mxu0 %v5213_v60  ;;  %v5271_v60 = vld [vmem:[%s7263_s3 + $0x78] sm:$0xff] }
 0x2fa   :  { %5810 = vmatprep.mubr.msk.f32.mxu0 %vm69_vm0, %v6497_v35  ;;  %5797 = vmatprep.subr.mxu1 %v5204_v61 }
 0x2fb   :  { %5804 = vmatprep.subr.mxu0 %v5212_v62  ;;  %5798 = vmatpush3.msra.mxu1 %v5204_v61  ;;  %v5265_v61 = vld [vmem:[%s7266_s6 + $0xb8] sm:$0xff] }
 0x2fc   :  { %5805 = vmatpush3.msra.mxu0 %v5212_v62  ;;  %5800 = vmatmul.mubr.msk.f32.vlgmr.msra.gmra.mxu1 %vm69_vm0, %v6503_v38 }
 0x2fd   :  { %5806 = vmatprep.subr.mxu0 %v5211_v63  ;;  %5813 = vmatprep.subr.mxu1 %v6406_v42 }
 0x2fe   :  { %5807 = vmatpush3.msra.mxu0 %v5211_v63  ;;  %5815 = vmatprep.mubr.msk.f32.mxu1 %vm6407_vm1, %v6406_v42  ;;  %v5264_v63 = vld [vmem:[%s7266_s6 + $0xb0] sm:$0xff] }
 0x2ff   :  { %5808 = vmatprep.subr.mxu0 %v5210_v0 }
 0x300   :  { %5809 = vmatpush3.msra.mxu0 %v5210_v0 }
 0x301   :  { %5811 = vmatmul.mubr.msk.f32.vlgmr.msra.gmra.mxu0 %vm69_vm0, %v6503_v38  ;;  %5823 = vmatprep.subr.mxu0 %v6406_v42 }
 0x302   :  { %5825 = vmatprep.mubr.msk.f32.mxu0 %vm6407_vm1, %v6406_v42 }
 0x3af   :  { %v581_v1 = vpop.f32.mrf.mxu0 }
 0x3b1   :  { %v5774_v2 = vpop.f32.mrf.mxu0 }
 0x3b3   :  { %v6594_v3 = vpop.f32.mrf.mxu1 }
 0x3b5   :  { %v5779_v4 = vpop.f32.mrf.mxu1 }
 0x3b6   :  { %v5262_v4 = vld [vmem:[%s7266_s6 + $0xa0] sm:$0xff] }
 0x3b7   :  { %v5790_v5 = vpop.f32.mrf.mxu0 }
 0x3b9   :  { %v737_v8 = vpop.f32.mrf.mxu0 }
 0x3bc   :  { %v5801_v6 = vpop.f32.mrf.mxu1 }
 0x3be   :  { %v817_v7 = vpop.f32.mrf.mxu1 }
 0x3bf   :  { %5814 = vmatpush3.xpose.msk.msra.mxu1 %vm358_vm2, %v817_v7  ;;  %v5261_v7 = vld [vmem:[%s7266_s6 + $0x98] sm:$0xff] }
 0x3c0   :  { %5818 = vmatprep.subr.mxu1 %v6406_v42 }
 0x3c1   :  { %v5812_v9 = vpop.f32.mrf.mxu0 }
 0x3c2   :  { %5816 = vmatmul.mubr.msk.f32.vlgmr.msra.gmra.mxu1 %vm358_vm2, %v737_v8  ;;  %v5268_v8 = vld [vmem:[%s7263_s3 + $0x60] sm:$0xff] }
 0x3c3   :  { %v897_v10 = vpop.f32.mrf.mxu0  ;;  %5819 = vmatpush3.xpose.msk.msra.mxu1 %vm358_vm2, %v5801_v6  ;;  %5820 = vmatprep.mubr.msk.f32.mxu1 %vm6407_vm1, %v6406_v42  ;;  %v5269_v6 = vld [vmem:[%s7263_s3 + $0x68] sm:$0xff] }
 0x3c4   :  { %5824 = vmatpush3.msra.mxu0 %v897_v10  ;;  %5828 = vmatprep.subr.mxu1 %v6406_v42  ;;  %v5277_v10 = vld [vmem:[%s7264_s4 + $0x78] sm:$0xff] }
 0x3c5   :  { %5833 = vmatprep.subr.mxu0 %v5229_v12 }
 0x3c6   :  { %5821 = vmatmul.mubr.msk.f32.vlgmr.msra.gmra.mxu1 %vm358_vm2, %v5790_v5 }
 0x3c7   :  { %5829 = vmatpush3.msra.mxu1 %v5812_v9  ;;  %5830 = vmatprep.mubr.msk.f32.mxu1 %vm6407_vm1, %v6406_v42  ;;  %v5260_v9 = vld [vmem:[%s7266_s6 + $0x90] sm:$0xff] }
 0x3c8   :  { %5852 = vmatprep.subr.mxu1 %v665_v11 }
 0x482   :  { %v978_v13 = vpop.f32.mrf.mxu1 }
 0x483   :  { %5826 = vmatmul.mubr.msk.f32.vlgmr.msra.gmra.mxu0 %vm511_vm3, %v978_v13  ;;  %v5274_v13 = vld [vmem:[%s7264_s4 + $0x60] sm:$0xff] }
 0x484   :  { %v5817_v15 = vpop.f32.mrf.mxu1  ;;  %5834 = vmatpush3.msra.mxu0 %v5229_v12  ;;  %v5275_v12 = vld [vmem:[%s7264_s4 + $0x68] sm:$0xff] }
 0x485   :  { %5835 = vmatprep.subr.mxu0 %v5228_v14  ;;  %v5258_v15 = vld [vmem:[%s7266_s6 + $0x80] sm:$0xff] }
 0x486   :  { %v1054_v17 = vpop.f32.mrf.mxu1  ;;  %5836 = vmatpush3.msra.mxu0 %v5228_v14  ;;  %v5259_v14 = vld [vmem:[%s7266_s6 + $0x88] sm:$0xff] }
 0x487   :  { %5831 = vmatmul.mubr.msk.f32.vlgmr.msra.gmra.mxu1 %vm511_vm3, %v1054_v17  ;;  %5837 = vmatprep.subr.mxu0 %v5227_v16 }
 0x488   :  { %5853 = vmatpush3.msra.mxu1 %v665_v11  ;;  %v5822_v20 = vpop.f32.mrf.mxu1  ;;  %5868 = vmatprep.mubr.msk.f32.mxu1 %vm358_vm2, %v581_v1  ;;  %v5263_v1 = vld [vmem:[%s7266_s6 + $0xa8] sm:$0xff]  ;;  %v5276_v11 = vld [vmem:[%s7264_s4 + $0x70] sm:$0xff] }
 0x489   :  { %5854 = vmatprep.subr.mxu1 %v664_v18  ;;  %5838 = vmatpush3.msra.mxu0 %v5227_v16  ;;  %v5283_v16 = vld [vmem:[%s7265_s5 + $0x78] sm:$0xff]  ;;  %v5282_v20 = vld [vmem:[%s7265_s5 + $0x70] sm:$0xff] }
 0x48a   :  { %5855 = vmatpush3.msra.mxu1 %v664_v18  ;;  %5839 = vmatprep.subr.mxu0 %v5226_v19 }
 0x48b   :  { %5856 = vmatprep.subr.mxu1 %v663_v21  ;;  %5840 = vmatpush3.msra.mxu0 %v5226_v19 }
 0x48c   :  { %5857 = vmatpush3.msra.mxu1 %v663_v21  ;;  %5841 = vmatprep.subr.mxu0 %v5225_v22 }
 0x48d   :  { %5858 = vmatprep.subr.mxu1 %v662_v23  ;;  %5842 = vmatpush3.msra.mxu0 %v5225_v22  ;;  %v5281_v22 = vld [vmem:[%s7265_s5 + $0x68] sm:$0xff] }
 0x48e   :  { %5859 = vmatpush3.msra.mxu1 %v662_v23  ;;  %5843 = vmatprep.subr.mxu0 %v5224_v24  ;;  %v5280_v23 = vld [vmem:[%s7265_s5 + $0x60] sm:$0xff] }
 0x48f   :  { %5860 = vmatprep.subr.mxu1 %v661_v25  ;;  %5844 = vmatpush3.msra.mxu0 %v5224_v24 }
 0x490   :  { %5861 = vmatpush3.msra.mxu1 %v661_v25  ;;  %5845 = vmatprep.subr.mxu0 %v5223_v33 }
 0x491   :  { %5862 = vmatprep.subr.mxu1 %v660_v26  ;;  %5846 = vmatpush3.msra.mxu0 %v5223_v33 }
 0x492   :  { %5863 = vmatpush3.msra.mxu1 %v660_v26  ;;  %5847 = vmatprep.subr.mxu0 %v5222_v34 }
 0x493   :  { %5864 = vmatprep.subr.mxu1 %v659_v27  ;;  %5848 = vmatpush3.msra.mxu0 %v5222_v34  ;;  %v5305_v34 = vld [vmem:[%s7263_s3 + $0x98] sm:$0xff] }
 0x494   :  { %5865 = vmatpush3.msra.mxu1 %v659_v27  ;;  %5871 = vmatprep.subr.mxu0 %v5237_v36 }
 0x495   :  { %5866 = vmatprep.subr.mxu1 %v658_v28 }
 0x496   :  { %5867 = vmatpush3.msra.mxu1 %v658_v28 }
 0x497   :  { %5869 = vmatmul.mubr.msk.f32.vlgmr.msra.gmra.mxu1 %vm358_vm2, %v6594_v3  ;;  %5882 = vmatprep.subr.mxu1 %v5243_v29  ;;  %v5270_v3 = vld [vmem:[%s7263_s3 + $0x70] sm:$0xff] }
 0x498   :  { %5883 = vmatpush3.msra.mxu1 %v5243_v29  ;;  %5890 = vmatprep.mubr.msk.f32.mxu1 %vm69_vm0, %v6497_v35 }
 0x499   :  { %5884 = vmatprep.subr.mxu1 %v5242_v30 }
 0x49a   :  { %5885 = vmatpush3.msra.mxu1 %v5242_v30 }
 0x49b   :  { %5886 = vmatprep.subr.mxu1 %v5241_v31 }
 0x49c   :  { %5887 = vmatpush3.msra.mxu1 %v5241_v31 }
 0x49d   :  { %5888 = vmatprep.subr.mxu1 %v5240_v32 }
 0x49e   :  { %5889 = vmatpush3.msra.mxu1 %v5240_v32 }
 0x49f   :  { %5891 = vmatmul.mubr.msk.f32.vlgmr.msra.gmra.mxu1 %vm69_vm0, %v6503_v38  ;;  %5904 = vmatprep.subr.mxu1 %v6406_v42 }
 0x4a0   :  { %5906 = vmatprep.mubr.msk.f32.mxu1 %vm6407_vm1, %v6406_v42 }
 0x543   :  { %v1127_v37 = vpop.f32.mrf.mxu0 }
 0x544   :  { %5849 = vmatprep.mubr.msk.f32.mxu0 %vm358_vm2, %v1127_v37  ;;  %v5299_v37 = vld [vmem:[%s7266_s6 + $0xf8] sm:$0xff] }
 0x545   :  { %v5827_v39 = vpop.f32.mrf.mxu0 }
 0x547   :  { %v1200_v40 = vpop.f32.mrf.mxu1 }
 0x548   :  { %5850 = vmatmul.mubr.msk.f32.vlgmr.msra.gmra.mxu0 %vm358_vm2, %v1200_v40 }
 0x549   :  { %5872 = vmatpush3.msra.mxu0 %v5237_v36  ;;  %v5832_v43 = vpop.f32.mrf.mxu1  ;;  %5879 = vmatprep.mubr.msk.f32.mxu0 %vm69_vm0, %v6497_v35 }
 0x54a   :  { %5873 = vmatprep.subr.mxu0 %v5236_v41 }
 0x54b   :  { %5874 = vmatpush3.msra.mxu0 %v5236_v41  ;;  %v5298_v41 = vld [vmem:[%s7266_s6 + $0xf0] sm:$0xff] }
 0x54c   :  { %5875 = vmatprep.subr.mxu0 %v5235_v44 }
 0x54d   :  { %5876 = vmatpush3.msra.mxu0 %v5235_v44  ;;  %v5297_v44 = vld [vmem:[%s7266_s6 + $0xe8] sm:$0xff] }
 0x54e   :  { %5877 = vmatprep.subr.mxu0 %v5234_v45 }
 0x54f   :  { %5878 = vmatpush3.msra.mxu0 %v5234_v45 }
 0x550   :  { %5880 = vmatmul.mubr.msk.f32.vlgmr.msra.gmra.mxu0 %vm69_vm0, %v6503_v38  ;;  %5893 = vmatprep.subr.mxu0 %v5249_v46 }
 0x551   :  { %5894 = vmatpush3.msra.mxu0 %v5249_v46  ;;  %5901 = vmatprep.mubr.msk.f32.mxu0 %vm69_vm0, %v6497_v35  ;;  %v5304_v46 = vld [vmem:[%s7263_s3 + $0x90] sm:$0xff] }
 0x552   :  { %5895 = vmatprep.subr.mxu0 %v5248_v47 }
 0x553   :  { %5896 = vmatpush3.msra.mxu0 %v5248_v47  ;;  %v5296_v47 = vld [vmem:[%s7266_s6 + $0xe0] sm:$0xff] }
 0x554   :  { %5897 = vmatprep.subr.mxu0 %v5247_v48 }
 0x555   :  { %5898 = vmatpush3.msra.mxu0 %v5247_v48 }
 0x556   :  { %5899 = vmatprep.subr.mxu0 %v5246_v49 }
 0x557   :  { %5900 = vmatpush3.msra.mxu0 %v5246_v49  ;;  %v6713_v50 = vpop.f32.mrf.mxu1  ;;  %v5303_v49 = vld [vmem:[%s7263_s3 + $0x88] sm:$0xff] }
 0x558   :  { %5902 = vmatmul.mubr.msk.f32.vlgmr.msra.gmra.mxu0 %vm69_vm0, %v6503_v38  ;;  %5914 = vmatprep.subr.mxu0 %v6406_v42 }
 0x559   :  { %5916 = vmatprep.mubr.msk.f32.mxu0 %vm6407_vm1, %v6406_v42  ;;  %v6717_v51 = vpop.f32.mrf.mxu1 }
 0x55f   :  { %v5892_v52 = vpop.f32.mrf.mxu1 }
 0x561   :  { %v1526_v53 = vpop.f32.mrf.mxu1 }
 0x562   :  { %5905 = vmatpush3.xpose.msk.msra.mxu1 %vm358_vm2, %v1526_v53  ;;  %v5311_v53 = vld [vmem:[%s7264_s4 + $0x98] sm:$0xff] }
 0x563   :  { %5909 = vmatprep.subr.mxu1 %v6406_v42 }
 0x608   :  { %v6721_v54 = vpop.f32.mrf.mxu0 }
 0x609   :  { %v1372_v28 = vadd.f32 %v6713_v50, %v6721_v54  ;;  %v5295_v50 = vld [vmem:[%s7266_s6 + $0xd8] sm:$0xff]  ;;  %v5310_v54 = vld [vmem:[%s7264_s4 + $0x90] sm:$0xff] }
 0x60a   :  { %v6723_v55 = vpop.f32.mrf.mxu0 }
 0x60b   :  { %v1367_v30 = vadd.f32 %v6717_v51, %v6723_v55  ;;  %v5302_v51 = vld [vmem:[%s7263_s3 + $0x80] sm:$0xff]  ;;  %v5309_v55 = vld [vmem:[%s7264_s4 + $0x88] sm:$0xff] }
 0x610   :  { %v5881_v56 = vpop.f32.mrf.mxu0 }
 0x612   :  { %v1446_v57 = vpop.f32.mrf.mxu0 }
 0x613   :  { %5907 = vmatmul.mubr.msk.f32.vlgmr.msra.gmra.mxu1 %vm358_vm2, %v1446_v57  ;;  %v5293_v57 = vld [vmem:[%s7266_s6 + $0xc8] sm:$0xff] }
 0x614   :  { %5910 = vmatpush3.xpose.msk.msra.mxu1 %vm358_vm2, %v5892_v52  ;;  %5911 = vmatprep.mubr.msk.f32.mxu1 %vm6407_vm1, %v6406_v42  ;;  %v5294_v52 = vld [vmem:[%s7266_s6 + $0xd0] sm:$0xff] }
 0x615   :  { %5919 = vmatprep.subr.mxu1 %v6406_v42 }
 0x617   :  { %5912 = vmatmul.mubr.msk.f32.vlgmr.msra.gmra.mxu1 %vm358_vm2, %v5881_v56  ;;  %v5308_v56 = vld [vmem:[%s7264_s4 + $0x80] sm:$0xff] }
 0x618   :  { %v5903_v58 = vpop.f32.mrf.mxu0  ;;  %5921 = vmatprep.mubr.msk.f32.mxu1 %vm6407_vm1, %v6406_v42 }
 0x619   :  { %5920 = vmatpush3.msra.mxu1 %v5903_v58  ;;  %v5292_v58 = vld [vmem:[%s7266_s6 + $0xc0] sm:$0xff] }
 0x61a   :  { %v1606_v59 = vpop.f32.mrf.mxu0  ;;  %5943 = vmatprep.subr.mxu1 %v5271_v60 }
 0x61b   :  { %5915 = vmatpush3.msra.mxu0 %v1606_v59  ;;  %v5317_v59 = vld [vmem:[%s7265_s5 + $0x98] sm:$0xff] }
 0x61c   :  { %5924 = vmatprep.subr.mxu0 %v5265_v61 }
 0x6d3   :  { %v1687_v62 = vpop.f32.mrf.mxu1 }
 0x6d4   :  { %5917 = vmatmul.mubr.msk.f32.vlgmr.msra.gmra.mxu0 %vm511_vm3, %v1687_v62 }
 0x6d5   :  { %v5908_v0 = vpop.f32.mrf.mxu1  ;;  %5925 = vmatpush3.msra.mxu0 %v5265_v61 }
 0x6d6   :  { %5926 = vmatprep.subr.mxu0 %v5264_v63 }
 0x6d7   :  { %v1763_v2 = vpop.f32.mrf.mxu1  ;;  %5927 = vmatpush3.msra.mxu0 %v5264_v63  ;;  %v5316_v63 = vld [vmem:[%s7265_s5 + $0x90] sm:$0xff] }
 0x6d8   :  { %5922 = vmatmul.mubr.msk.f32.vlgmr.msra.gmra.mxu1 %vm511_vm3, %v1763_v2  ;;  %5928 = vmatprep.subr.mxu0 %v5263_v1  ;;  %v5314_v2 = vld [vmem:[%s7265_s5 + $0x80] sm:$0xff] }
 0x6d9   :  { %5944 = vmatpush3.msra.mxu1 %v5271_v60  ;;  %v5913_v5 = vpop.f32.mrf.mxu1  ;;  %5951 = vmatprep.mubr.msk.f32.mxu1 %vm69_vm0, %v6497_v35 }
 0x6da   :  { %5945 = vmatprep.subr.mxu1 %v5270_v3  ;;  %5929 = vmatpush3.msra.mxu0 %v5263_v1  ;;  %v5315_v1 = vld [vmem:[%s7265_s5 + $0x88] sm:$0xff] }
 0x6db   :  { %5946 = vmatpush3.msra.mxu1 %v5270_v3  ;;  %5930 = vmatprep.subr.mxu0 %v5262_v4 }
 0x6dc   :  { %5947 = vmatprep.subr.mxu1 %v5269_v6  ;;  %5931 = vmatpush3.msra.mxu0 %v5262_v4 }
 0x6dd   :  { %5948 = vmatpush3.msra.mxu1 %v5269_v6  ;;  %5932 = vmatprep.subr.mxu0 %v5261_v7 }
 0x6de   :  { %5949 = vmatprep.subr.mxu1 %v5268_v8  ;;  %5933 = vmatpush3.msra.mxu0 %v5261_v7 }
 0x6df   :  { %5950 = vmatpush3.msra.mxu1 %v5268_v8  ;;  %5934 = vmatprep.subr.mxu0 %v5260_v9 }
 0x6e0   :  { %5952 = vmatmul.mubr.msk.f32.vlgmr.msra.gmra.mxu1 %vm69_vm0, %v6503_v38  ;;  %5954 = vmatprep.subr.mxu1 %v5277_v10 }
 0x6e1   :  { %5955 = vmatpush3.msra.mxu1 %v5277_v10  ;;  %5962 = vmatprep.mubr.msk.f32.mxu1 %vm69_vm0, %v6497_v35 }
 0x6e2   :  { %5956 = vmatprep.subr.mxu1 %v5276_v11  ;;  %5935 = vmatpush3.msra.mxu0 %v5260_v9 }
 0x6e3   :  { %5957 = vmatpush3.msra.mxu1 %v5276_v11  ;;  %5936 = vmatprep.subr.mxu0 %v5259_v14  ;;  %v5339_v11 = vld [vmem:[%s7263_s3 + $0xb8] sm:$0xff] }
 0x6e4   :  { %5958 = vmatprep.subr.mxu1 %v5275_v12  ;;  %5937 = vmatpush3.msra.mxu0 %v5259_v14 }
 0x6e5   :  { %5959 = vmatpush3.msra.mxu1 %v5275_v12  ;;  %5938 = vmatprep.subr.mxu0 %v5258_v15 }
 0x6e6   :  { %5960 = vmatprep.subr.mxu1 %v5274_v13  ;;  %5939 = vmatpush3.msra.mxu0 %v5258_v15 }
 0x6e7   :  { %5961 = vmatpush3.msra.mxu1 %v5274_v13  ;;  %5965 = vmatprep.subr.mxu0 %v5283_v16  ;;  %v5333_v13 = vld [vmem:[%s7266_s6 + $0x138] sm:$0xff] }
 0x6e8   :  { %5963 = vmatmul.mubr.msk.f32.vlgmr.msra.gmra.mxu1 %vm69_vm0, %v6503_v38  ;;  %5976 = vmatprep.subr.mxu1 %v6406_v42 }
 0x6e9   :  { %5978 = vmatprep.mubr.msk.f32.mxu1 %vm6407_vm1, %v6406_v42 }
 0x794   :  { %v1836_v17 = vpop.f32.mrf.mxu0 }
 0x795   :  { %5940 = vmatprep.mubr.msk.f32.mxu0 %vm358_vm2, %v1836_v17 }
 0x796   :  { %v5918_v18 = vpop.f32.mrf.mxu0 }
 0x797   :  { %v5331_v18 = vld [vmem:[%s7266_s6 + $0x128] sm:$0xff] }
 0x798   :  { %v1909_v19 = vpop.f32.mrf.mxu1 }
 0x799   :  { %5941 = vmatmul.mubr.msk.f32.vlgmr.msra.gmra.mxu0 %vm358_vm2, %v1909_v19 }
 0x79a   :  { %5966 = vmatpush3.msra.mxu0 %v5283_v16  ;;  %v5923_v21 = vpop.f32.mrf.mxu1  ;;  %5973 = vmatprep.mubr.msk.f32.mxu0 %vm69_vm0, %v6497_v35  ;;  %v5332_v16 = vld [vmem:[%s7266_s6 + $0x130] sm:$0xff] }
 0x79b   :  { %5967 = vmatprep.subr.mxu0 %v5282_v20  ;;  %v5330_v21 = vld [vmem:[%s7266_s6 + $0x120] sm:$0xff] }
 0x79c   :  { %5968 = vmatpush3.msra.mxu0 %v5282_v20  ;;  %v5338_v20 = vld [vmem:[%s7263_s3 + $0xb0] sm:$0xff] }
 0x79d   :  { %5969 = vmatprep.subr.mxu0 %v5281_v22 }
 0x79e   :  { %5970 = vmatpush3.msra.mxu0 %v5281_v22 }
 0x79f   :  { %5971 = vmatprep.subr.mxu0 %v5280_v23 }
 0x7a0   :  { %5972 = vmatpush3.msra.mxu0 %v5280_v23  ;;  %v5953_v24 = vpop.f32.mrf.mxu1  ;;  %v5337_v23 = vld [vmem:[%s7263_s3 + $0xa8] sm:$0xff] }
 0x7a1   :  { %5974 = vmatmul.mubr.msk.f32.vlgmr.msra.gmra.mxu0 %vm69_vm0, %v6503_v38  ;;  %5986 = vmatprep.subr.mxu0 %v6406_v42 }
 0x7a2   :  { %5988 = vmatprep.mubr.msk.f32.mxu0 %vm6407_vm1, %v6406_v42  ;;  %v2076_v25 = vpop.f32.mrf.mxu1 }
 0x7a8   :  { %v5964_v26 = vpop.f32.mrf.mxu1 }
 0x7aa   :  { %v2156_v27 = vpop.f32.mrf.mxu1 }
 0x7ab   :  { %5977 = vmatpush3.xpose.msk.msra.mxu1 %vm358_vm2, %v2156_v27  ;;  %v5345_v27 = vld [vmem:[%s7264_s4 + $0xb8] sm:$0xff] }
 0x7ac   :  { %5981 = vmatprep.subr.mxu1 %v6406_v42 }
 0x7ae   :  { %5979 = vmatmul.mubr.msk.f32.vlgmr.msra.gmra.mxu1 %vm358_vm2, %v2076_v25  ;;  %v5336_v25 = vld [vmem:[%s7263_s3 + $0xa0] sm:$0xff] }
 0x7af   :  { %5982 = vmatpush3.xpose.msk.msra.mxu1 %vm358_vm2, %v5964_v26  ;;  %5983 = vmatprep.mubr.msk.f32.mxu1 %vm6407_vm1, %v6406_v42  ;;  %v5328_v26 = vld [vmem:[%s7266_s6 + $0x110] sm:$0xff] }
 0x7b0   :  { %5991 = vmatprep.subr.mxu1 %v6406_v42 }
 0x7b2   :  { %5984 = vmatmul.mubr.msk.f32.vlgmr.msra.gmra.mxu1 %vm358_vm2, %v5953_v24  ;;  %v5329_v24 = vld [vmem:[%s7266_s6 + $0x118] sm:$0xff] }
 0x7b3   :  { %5993 = vmatprep.mubr.msk.f32.mxu1 %vm6407_vm1, %v6406_v42 }
 0x859   :  { %v5942_v29 = vpop.f32.mrf.mxu0 }
 0x85a   :  { %v6829_v31 = vadd.f32 %v5942_v29, %v1372_v28  ;;  %v5344_v28 = vld [vmem:[%s7264_s4 + $0xb0] sm:$0xff]  ;;  %v5343_v29 = vld [vmem:[%s7264_s4 + $0xa8] sm:$0xff] }
 0x85b   :  { %v1994_v32 = vpop.f32.mrf.mxu0 }
 0x85c   :  { %v6831_v33 = vadd.f32 %v1994_v32, %v1367_v30  ;;  %v5342_v30 = vld [vmem:[%s7264_s4 + $0xa0] sm:$0xff] }
 0x85d   :  { %v5326_v32 = vld [vmem:[%s7266_s6 + $0x100] sm:$0xff] }
 0x861   :  { %v5975_v36 = vpop.f32.mrf.mxu0 }
 0x862   :  { %5992 = vmatpush3.msra.mxu1 %v5975_v36 }
 0x863   :  { %v2236_v39 = vpop.f32.mrf.mxu0  ;;  %6015 = vmatprep.subr.mxu1 %v5305_v34 }
 0x864   :  { %5987 = vmatpush3.msra.mxu0 %v2236_v39  ;;  %v5350_v39 = vld [vmem:[%s7265_s5 + $0xb0] sm:$0xff] }
 0x865   :  { %5996 = vmatprep.subr.mxu0 %v5299_v37 }
 0x86e   :  { %v2317_v40 = vpop.f32.mrf.mxu1 }
 0x86f   :  { %5989 = vmatmul.mubr.msk.f32.vlgmr.msra.gmra.mxu0 %vm511_vm3, %v2317_v40 }
 0x870   :  { %v5980_v43 = vpop.f32.mrf.mxu1  ;;  %5997 = vmatpush3.msra.mxu0 %v5299_v37 }
 0x871   :  { %5998 = vmatprep.subr.mxu0 %v5298_v41  ;;  %v5348_v43 = vld [vmem:[%s7265_s5 + $0xa0] sm:$0xff] }
 0x872   :  { %v2393_v45 = vpop.f32.mrf.mxu1  ;;  %5999 = vmatpush3.msra.mxu0 %v5298_v41  ;;  %v5349_v41 = vld [vmem:[%s7265_s5 + $0xa8] sm:$0xff] }
 0x873   :  { %5994 = vmatmul.mubr.msk.f32.vlgmr.msra.gmra.mxu1 %vm511_vm3, %v2393_v45  ;;  %6000 = vmatprep.subr.mxu0 %v5297_v44 }
 0x874   :  { %6016 = vmatpush3.msra.mxu1 %v5305_v34  ;;  %v5985_v48 = vpop.f32.mrf.mxu1  ;;  %6023 = vmatprep.mubr.msk.f32.mxu1 %vm69_vm0, %v6497_v35 }
 0x875   :  { %6017 = vmatprep.subr.mxu1 %v5304_v46  ;;  %6001 = vmatpush3.msra.mxu0 %v5297_v44 }
 0x876   :  { %6018 = vmatpush3.msra.mxu1 %v5304_v46  ;;  %6002 = vmatprep.subr.mxu0 %v5296_v47 }
 0x877   :  { %6019 = vmatprep.subr.mxu1 %v5303_v49  ;;  %6003 = vmatpush3.msra.mxu0 %v5296_v47 }
 0x878   :  { %6020 = vmatpush3.msra.mxu1 %v5303_v49  ;;  %6004 = vmatprep.subr.mxu0 %v5295_v50 }
 0x879   :  { %6021 = vmatprep.subr.mxu1 %v5302_v51  ;;  %6005 = vmatpush3.msra.mxu0 %v5295_v50 }
 0x87a   :  { %6022 = vmatpush3.msra.mxu1 %v5302_v51  ;;  %6006 = vmatprep.subr.mxu0 %v5294_v52 }
 0x87b   :  { %6024 = vmatmul.mubr.msk.f32.vlgmr.msra.gmra.mxu1 %vm69_vm0, %v6503_v38  ;;  %6026 = vmatprep.subr.mxu1 %v5311_v53 }
 0x87c   :  { %6027 = vmatpush3.msra.mxu1 %v5311_v53  ;;  %6034 = vmatprep.mubr.msk.f32.mxu1 %vm69_vm0, %v6497_v35 }
 0x87d   :  { %6028 = vmatprep.subr.mxu1 %v5310_v54  ;;  %6007 = vmatpush3.msra.mxu0 %v5294_v52  ;;  %v5373_v52 = vld [vmem:[%s7263_s3 + $0xd8] sm:$0xff] }
 0x87e   :  { %6029 = vmatpush3.msra.mxu1 %v5310_v54  ;;  %6008 = vmatprep.subr.mxu0 %v5293_v57  ;;  %v5367_v54 = vld [vmem:[%s7266_s6 + $0x178] sm:$0xff] }
 0x87f   :  { %6030 = vmatprep.subr.mxu1 %v5309_v55  ;;  %6009 = vmatpush3.msra.mxu0 %v5293_v57  ;;  %v5366_v57 = vld [vmem:[%s7266_s6 + $0x170] sm:$0xff] }
 0x880   :  { %6031 = vmatpush3.msra.mxu1 %v5309_v55  ;;  %6010 = vmatprep.subr.mxu0 %v5292_v58 }
 0x881   :  { %6032 = vmatprep.subr.mxu1 %v5308_v56  ;;  %6011 = vmatpush3.msra.mxu0 %v5292_v58 }
 0x882   :  { %6033 = vmatpush3.msra.mxu1 %v5308_v56  ;;  %6037 = vmatprep.subr.mxu0 %v5317_v59 }
 0x883   :  { %6035 = vmatmul.mubr.msk.f32.vlgmr.msra.gmra.mxu1 %vm69_vm0, %v6503_v38  ;;  %6048 = vmatprep.subr.mxu1 %v6406_v42 }
 0x884   :  { %6050 = vmatprep.mubr.msk.f32.mxu1 %vm6407_vm1, %v6406_v42 }
 0x92f   :  { %v2466_v60 = vpop.f32.mrf.mxu0 }
 0x930   :  { %6012 = vmatprep.mubr.msk.f32.mxu0 %vm358_vm2, %v2466_v60 }
 0x931   :  { %v5990_v61 = vpop.f32.mrf.mxu0 }
 0x932   :  { %v5372_v61 = vld [vmem:[%s7263_s3 + $0xd0] sm:$0xff] }
 0x933   :  { %v2539_v62 = vpop.f32.mrf.mxu1 }
 0x934   :  { %6013 = vmatmul.mubr.msk.f32.vlgmr.msra.gmra.mxu0 %vm358_vm2, %v2539_v62  ;;  %v5364_v62 = vld [vmem:[%s7266_s6 + $0x160] sm:$0xff] }
 0x935   :  { %6038 = vmatpush3.msra.mxu0 %v5317_v59  ;;  %v5995_v0 = vpop.f32.mrf.mxu1  ;;  %6045 = vmatprep.mubr.msk.f32.mxu0 %vm69_vm0, %v6497_v35  ;;  %v5365_v59 = vld [vmem:[%s7266_s6 + $0x168] sm:$0xff] }
 0x936   :  { %6039 = vmatprep.subr.mxu0 %v5316_v63  ;;  %v5371_v0 = vld [vmem:[%s7263_s3 + $0xc8] sm:$0xff] }
 0x937   :  { %6040 = vmatpush3.msra.mxu0 %v5316_v63 }
 0x938   :  { %6041 = vmatprep.subr.mxu0 %v5315_v1 }
 0x939   :  { %6042 = vmatpush3.msra.mxu0 %v5315_v1  ;;  %v5363_v1 = vld [vmem:[%s7266_s6 + $0x158] sm:$0xff] }
 0x93a   :  { %6043 = vmatprep.subr.mxu0 %v5314_v2 }
 0x93b   :  { %6044 = vmatpush3.msra.mxu0 %v5314_v2  ;;  %v6025_v3 = vpop.f32.mrf.mxu1  ;;  %v5370_v2 = vld [vmem:[%s7263_s3 + $0xc0] sm:$0xff] }
 0x93c   :  { %6046 = vmatmul.mubr.msk.f32.vlgmr.msra.gmra.mxu0 %vm69_vm0, %v6503_v38  ;;  %6058 = vmatprep.subr.mxu0 %v6406_v42 }
 0x93d   :  { %6060 = vmatprep.mubr.msk.f32.mxu0 %vm6407_vm1, %v6406_v42  ;;  %v2706_v4 = vpop.f32.mrf.mxu1 }
 0x943   :  { %v6036_v5 = vpop.f32.mrf.mxu1 }
 0x945   :  { %v2786_v6 = vpop.f32.mrf.mxu1 }
 0x946   :  { %6049 = vmatpush3.xpose.msk.msra.mxu1 %vm358_vm2, %v2786_v6  ;;  %v5377_v6 = vld [vmem:[%s7264_s4 + $0xc8] sm:$0xff] }
 0x947   :  { %6053 = vmatprep.subr.mxu1 %v6406_v42 }
 0x949   :  { %6051 = vmatmul.mubr.msk.f32.vlgmr.msra.gmra.mxu1 %vm358_vm2, %v2706_v4  ;;  %v5379_v4 = vld [vmem:[%s7264_s4 + $0xd8] sm:$0xff] }
 0x94a   :  { %6054 = vmatpush3.xpose.msk.msra.mxu1 %vm358_vm2, %v6036_v5  ;;  %6055 = vmatprep.mubr.msk.f32.mxu1 %vm6407_vm1, %v6406_v42  ;;  %v5378_v5 = vld [vmem:[%s7264_s4 + $0xd0] sm:$0xff] }
 0x94b   :  { %6063 = vmatprep.subr.mxu1 %v6406_v42 }
 0x94d   :  { %6056 = vmatmul.mubr.msk.f32.vlgmr.msra.gmra.mxu1 %vm358_vm2, %v6025_v3  ;;  %v5362_v3 = vld [vmem:[%s7266_s6 + $0x150] sm:$0xff] }
 0x94e   :  { %6065 = vmatprep.mubr.msk.f32.mxu1 %vm6407_vm1, %v6406_v42 }
 0x9f4   :  { %v6014_v7 = vpop.f32.mrf.mxu0 }
 0x9f5   :  { %v6926_v8 = vadd.f32 %v6014_v7, %v6829_v31  ;;  %v5327_v31 = vld [vmem:[%s7266_s6 + $0x108] sm:$0xff]  ;;  %v5376_v7 = vld [vmem:[%s7264_s4 + $0xc0] sm:$0xff] }
 0x9f6   :  { %v2624_v9 = vpop.f32.mrf.mxu0 }
 0x9f7   :  { %v6929_v10 = vadd.f32 %v2624_v9, %v6831_v33  ;;  %v5351_v33 = vld [vmem:[%s7265_s5 + $0xb8] sm:$0xff]  ;;  %v5360_v9 = vld [vmem:[%s7266_s6 + $0x140] sm:$0xff] }
 0x9fc   :  { %v6047_v12 = vpop.f32.mrf.mxu0 }
 0x9fd   :  { %6064 = vmatpush3.msra.mxu1 %v6047_v12 }
 0x9fe   :  { %v2866_v14 = vpop.f32.mrf.mxu0  ;;  %6087 = vmatprep.subr.mxu1 %v5339_v11 }
 0x9ff   :  { %6059 = vmatpush3.msra.mxu0 %v2866_v14  ;;  %v5384_v14 = vld [vmem:[%s7265_s5 + $0xd0] sm:$0xff] }
 0xa00   :  { %6068 = vmatprep.subr.mxu0 %v5333_v13 }
 0xa09   :  { %v2947_v15 = vpop.f32.mrf.mxu1 }
 0xa0a   :  { %6061 = vmatmul.mubr.msk.f32.vlgmr.msra.gmra.mxu0 %vm511_vm3, %v2947_v15 }
 0xa0b   :  { %v6052_v17 = vpop.f32.mrf.mxu1  ;;  %6069 = vmatpush3.msra.mxu0 %v5333_v13 }
 0xa0c   :  { %6070 = vmatprep.subr.mxu0 %v5332_v16  ;;  %v5382_v17 = vld [vmem:[%s7265_s5 + $0xc0] sm:$0xff] }
 0xa0d   :  { %v3023_v19 = vpop.f32.mrf.mxu1  ;;  %6071 = vmatpush3.msra.mxu0 %v5332_v16  ;;  %v5383_v16 = vld [vmem:[%s7265_s5 + $0xc8] sm:$0xff] }
 0xa0e   :  { %6066 = vmatmul.mubr.msk.f32.vlgmr.msra.gmra.mxu1 %vm511_vm3, %v3023_v19  ;;  %6072 = vmatprep.subr.mxu0 %v5331_v18 }
 0xa0f   :  { %6088 = vmatpush3.msra.mxu1 %v5339_v11  ;;  %v6057_v22 = vpop.f32.mrf.mxu1  ;;  %6095 = vmatprep.mubr.msk.f32.mxu1 %vm69_vm0, %v6497_v35 }
 0xa10   :  { %6089 = vmatprep.subr.mxu1 %v5338_v20  ;;  %6073 = vmatpush3.msra.mxu0 %v5331_v18 }
 0xa11   :  { %6090 = vmatpush3.msra.mxu1 %v5338_v20  ;;  %6074 = vmatprep.subr.mxu0 %v5330_v21 }
 0xa12   :  { %6091 = vmatprep.subr.mxu1 %v5337_v23  ;;  %6075 = vmatpush3.msra.mxu0 %v5330_v21 }
 0xa13   :  { %6092 = vmatpush3.msra.mxu1 %v5337_v23  ;;  %6076 = vmatprep.subr.mxu0 %v5329_v24 }
 0xa14   :  { %6093 = vmatprep.subr.mxu1 %v5336_v25  ;;  %6077 = vmatpush3.msra.mxu0 %v5329_v24 }
 0xa15   :  { %6094 = vmatpush3.msra.mxu1 %v5336_v25  ;;  %6078 = vmatprep.subr.mxu0 %v5328_v26 }
 0xa16   :  { %6096 = vmatmul.mubr.msk.f32.vlgmr.msra.gmra.mxu1 %vm69_vm0, %v6503_v38  ;;  %6098 = vmatprep.subr.mxu1 %v5345_v27 }
 0xa17   :  { %6099 = vmatpush3.msra.mxu1 %v5345_v27  ;;  %6106 = vmatprep.mubr.msk.f32.mxu1 %vm69_vm0, %v6497_v35 }
 0xa18   :  { %6100 = vmatprep.subr.mxu1 %v5344_v28  ;;  %6079 = vmatpush3.msra.mxu0 %v5328_v26  ;;  %v5407_v26 = vld [vmem:[%s7263_s3 + $0xf8] sm:$0xff] }
 0xa19   :  { %6101 = vmatpush3.msra.mxu1 %v5344_v28  ;;  %6080 = vmatprep.subr.mxu0 %v5327_v31  ;;  %v5401_v28 = vld [vmem:[%s7266_s6 + $0x1b8] sm:$0xff] }
 0xa1a   :  { %6102 = vmatprep.subr.mxu1 %v5343_v29  ;;  %6081 = vmatpush3.msra.mxu0 %v5327_v31  ;;  %v5400_v31 = vld [vmem:[%s7266_s6 + $0x1b0] sm:$0xff] }
 0xa1b   :  { %6103 = vmatpush3.msra.mxu1 %v5343_v29  ;;  %6082 = vmatprep.subr.mxu0 %v5326_v32 }
 0xa1c   :  { %6104 = vmatprep.subr.mxu1 %v5342_v30  ;;  %6083 = vmatpush3.msra.mxu0 %v5326_v32 }
 0xa1d   :  { %6105 = vmatpush3.msra.mxu1 %v5342_v30  ;;  %6109 = vmatprep.subr.mxu0 %v5351_v33 }
 0xa1e   :  { %6107 = vmatmul.mubr.msk.f32.vlgmr.msra.gmra.mxu1 %vm69_vm0, %v6503_v38  ;;  %6120 = vmatprep.subr.mxu1 %v6406_v42 }
 0xa1f   :  { %6122 = vmatprep.mubr.msk.f32.mxu1 %vm6407_vm1, %v6406_v42 }
 0xaca   :  { %v3096_v34 = vpop.f32.mrf.mxu0 }
 0xacb   :  { %6084 = vmatprep.mubr.msk.f32.mxu0 %vm358_vm2, %v3096_v34 }
 0xacc   :  { %v6062_v36 = vpop.f32.mrf.mxu0 }
 0xacd   :  { %v5406_v36 = vld [vmem:[%s7263_s3 + $0xf0] sm:$0xff] }
 0xace   :  { %v3169_v37 = vpop.f32.mrf.mxu1 }
 0xacf   :  { %6085 = vmatmul.mubr.msk.f32.vlgmr.msra.gmra.mxu0 %vm358_vm2, %v3169_v37  ;;  %v5398_v37 = vld [vmem:[%s7266_s6 + $0x1a0] sm:$0xff] }
 0xad0   :  { %6110 = vmatpush3.msra.mxu0 %v5351_v33  ;;  %v6067_v40 = vpop.f32.mrf.mxu1  ;;  %6117 = vmatprep.mubr.msk.f32.mxu0 %vm69_vm0, %v6497_v35  ;;  %v5399_v33 = vld [vmem:[%s7266_s6 + $0x1a8] sm:$0xff] }
 0xad1   :  { %6111 = vmatprep.subr.mxu0 %v5350_v39  ;;  %v5405_v40 = vld [vmem:[%s7263_s3 + $0xe8] sm:$0xff] }
 0xad2   :  { %6112 = vmatpush3.msra.mxu0 %v5350_v39 }
 0xad3   :  { %6113 = vmatprep.subr.mxu0 %v5349_v41 }
 0xad4   :  { %6114 = vmatpush3.msra.mxu0 %v5349_v41  ;;  %v5397_v41 = vld [vmem:[%s7266_s6 + $0x198] sm:$0xff] }
 0xad5   :  { %6115 = vmatprep.subr.mxu0 %v5348_v43 }
 0xad6   :  { %6116 = vmatpush3.msra.mxu0 %v5348_v43  ;;  %v6097_v44 = vpop.f32.mrf.mxu1  ;;  %v5404_v43 = vld [vmem:[%s7263_s3 + $0xe0] sm:$0xff] }
 0xad7   :  { %6118 = vmatmul.mubr.msk.f32.vlgmr.msra.gmra.mxu0 %vm69_vm0, %v6503_v38  ;;  %6130 = vmatprep.subr.mxu0 %v6406_v42 }
 0xad8   :  { %6132 = vmatprep.mubr.msk.f32.mxu0 %vm6407_vm1, %v6406_v42  ;;  %v3336_v45 = vpop.f32.mrf.mxu1 }
 0xade   :  { %v6108_v46 = vpop.f32.mrf.mxu1 }
 0xae0   :  { %v3416_v47 = vpop.f32.mrf.mxu1 }
 0xae1   :  { %6121 = vmatpush3.xpose.msk.msra.mxu1 %vm358_vm2, %v3416_v47  ;;  %v5411_v47 = vld [vmem:[%s7264_s4 + $0xe8] sm:$0xff] }
 0xae2   :  { %6125 = vmatprep.subr.mxu1 %v6406_v42 }
 0xae4   :  { %6123 = vmatmul.mubr.msk.f32.vlgmr.msra.gmra.mxu1 %vm358_vm2, %v3336_v45  ;;  %v5413_v45 = vld [vmem:[%s7264_s4 + $0xf8] sm:$0xff] }
 0xae5   :  { %6126 = vmatpush3.xpose.msk.msra.mxu1 %vm358_vm2, %v6108_v46  ;;  %6127 = vmatprep.mubr.msk.f32.mxu1 %vm6407_vm1, %v6406_v42  ;;  %v5412_v46 = vld [vmem:[%s7264_s4 + $0xf0] sm:$0xff] }
 0xae6   :  { %6135 = vmatprep.subr.mxu1 %v6406_v42 }
 0xae8   :  { %6128 = vmatmul.mubr.msk.f32.vlgmr.msra.gmra.mxu1 %vm358_vm2, %v6097_v44  ;;  %v5396_v44 = vld [vmem:[%s7266_s6 + $0x190] sm:$0xff] }
 0xae9   :  { %6137 = vmatprep.mubr.msk.f32.mxu1 %vm6407_vm1, %v6406_v42 }
 0xb8f   :  { %v6086_v48 = vpop.f32.mrf.mxu0 }
 0xb90   :  { %v7024_v49 = vadd.f32 %v6086_v48, %v6926_v8  ;;  %v5361_v8 = vld [vmem:[%s7266_s6 + $0x148] sm:$0xff]  ;;  %v5410_v48 = vld [vmem:[%s7264_s4 + $0xe0] sm:$0xff] }
 0xb91   :  { %v3254_v50 = vpop.f32.mrf.mxu0 }
 0xb92   :  { %v7027_v51 = vadd.f32 %v3254_v50, %v6929_v10  ;;  %v5385_v10 = vld [vmem:[%s7265_s5 + $0xd8] sm:$0xff]  ;;  %v5394_v50 = vld [vmem:[%s7266_s6 + $0x180] sm:$0xff] }
 0xb97   :  { %v6119_v53 = vpop.f32.mrf.mxu0 }
 0xb98   :  { %6136 = vmatpush3.msra.mxu1 %v6119_v53 }
 0xb99   :  { %v3496_v55 = vpop.f32.mrf.mxu0  ;;  %6159 = vmatprep.subr.mxu1 %v5373_v52 }
 0xb9a   :  { %6131 = vmatpush3.msra.mxu0 %v3496_v55  ;;  %v5418_v55 = vld [vmem:[%s7265_s5 + $0xf0] sm:$0xff] }
 0xb9b   :  { %6140 = vmatprep.subr.mxu0 %v5367_v54 }
 0xba4   :  { %v3577_v56 = vpop.f32.mrf.mxu1 }
 0xba5   :  { %6133 = vmatmul.mubr.msk.f32.vlgmr.msra.gmra.mxu0 %vm511_vm3, %v3577_v56 }
 0xba6   :  { %v6124_v58 = vpop.f32.mrf.mxu1  ;;  %6141 = vmatpush3.msra.mxu0 %v5367_v54 }
 0xba7   :  { %6142 = vmatprep.subr.mxu0 %v5366_v57  ;;  %v5416_v58 = vld [vmem:[%s7265_s5 + $0xe0] sm:$0xff] }
 0xba8   :  { %v3653_v60 = vpop.f32.mrf.mxu1  ;;  %6143 = vmatpush3.msra.mxu0 %v5366_v57  ;;  %v5417_v57 = vld [vmem:[%s7265_s5 + $0xe8] sm:$0xff] }
 0xba9   :  { %6138 = vmatmul.mubr.msk.f32.vlgmr.msra.gmra.mxu1 %vm511_vm3, %v3653_v60  ;;  %6144 = vmatprep.subr.mxu0 %v5365_v59 }
 0xbaa   :  { %6160 = vmatpush3.msra.mxu1 %v5373_v52  ;;  %v6129_v63 = vpop.f32.mrf.mxu1  ;;  %6167 = vmatprep.mubr.msk.f32.mxu1 %vm69_vm0, %v6497_v35 }
 0xbab   :  { %6161 = vmatprep.subr.mxu1 %v5372_v61  ;;  %6145 = vmatpush3.msra.mxu0 %v5365_v59 }
 0xbac   :  { %6162 = vmatpush3.msra.mxu1 %v5372_v61  ;;  %6146 = vmatprep.subr.mxu0 %v5364_v62 }
 0xbad   :  { %6163 = vmatprep.subr.mxu1 %v5371_v0  ;;  %6147 = vmatpush3.msra.mxu0 %v5364_v62 }
 0xbae   :  { %6164 = vmatpush3.msra.mxu1 %v5371_v0  ;;  %6148 = vmatprep.subr.mxu0 %v5363_v1 }
 0xbaf   :  { %6165 = vmatprep.subr.mxu1 %v5370_v2  ;;  %6149 = vmatpush3.msra.mxu0 %v5363_v1 }
 0xbb0   :  { %6166 = vmatpush3.msra.mxu1 %v5370_v2  ;;  %6150 = vmatprep.subr.mxu0 %v5362_v3  ;;  %v5435_v2 = vld [vmem:[%s7266_s6 + $0x1f8] sm:$0xff] }
 0xbb1   :  { %6168 = vmatmul.mubr.msk.f32.vlgmr.msra.gmra.mxu1 %vm69_vm0, %v6503_v38  ;;  %6170 = vmatprep.subr.mxu1 %v5379_v4 }
 0xbb2   :  { %6171 = vmatpush3.msra.mxu1 %v5379_v4  ;;  %6178 = vmatprep.mubr.msk.f32.mxu1 %vm69_vm0, %v6497_v35 }
 0xbb3   :  { %6172 = vmatprep.subr.mxu1 %v5378_v5  ;;  %6151 = vmatpush3.msra.mxu0 %v5362_v3 }
 0xbb4   :  { %6173 = vmatpush3.msra.mxu1 %v5378_v5  ;;  %6152 = vmatprep.subr.mxu0 %v5361_v8 }
 0xbb5   :  { %6174 = vmatprep.subr.mxu1 %v5377_v6  ;;  %6153 = vmatpush3.msra.mxu0 %v5361_v8  ;;  %v5432_v8 = vld [vmem:[%s7266_s6 + $0x1e0] sm:$0xff] }
 0xbb6   :  { %6175 = vmatpush3.msra.mxu1 %v5377_v6  ;;  %6154 = vmatprep.subr.mxu0 %v5360_v9  ;;  %v5433_v6 = vld [vmem:[%s7266_s6 + $0x1e8] sm:$0xff] }
 0xbb7   :  { %6176 = vmatprep.subr.mxu1 %v5376_v7  ;;  %6155 = vmatpush3.msra.mxu0 %v5360_v9 }
 0xbb8   :  { %6177 = vmatpush3.msra.mxu1 %v5376_v7  ;;  %6181 = vmatprep.subr.mxu0 %v5385_v10 }
 0xbb9   :  { %6179 = vmatmul.mubr.msk.f32.vlgmr.msra.gmra.mxu1 %vm69_vm0, %v6503_v38  ;;  %6192 = vmatprep.subr.mxu1 %v6406_v42 }
 0xbba   :  { %6194 = vmatprep.mubr.msk.f32.mxu1 %vm6407_vm1, %v6406_v42 }
 0xc65   :  { %v3726_v11 = vpop.f32.mrf.mxu0 }
 0xc66   :  { %6156 = vmatprep.mubr.msk.f32.mxu0 %vm358_vm2, %v3726_v11  ;;  %v5430_v11 = vld [vmem:[%s7266_s6 + $0x1d0] sm:$0xff] }
 0xc67   :  { %v6134_v12 = vpop.f32.mrf.mxu0 }
 0xc68   :  { %v5429_v12 = vld [vmem:[%s7266_s6 + $0x1c8] sm:$0xff] }
 0xc69   :  { %v3799_v13 = vpop.f32.mrf.mxu1 }
 0xc6a   :  { %6157 = vmatmul.mubr.msk.f32.vlgmr.msra.gmra.mxu0 %vm358_vm2, %v3799_v13  ;;  %v5428_v13 = vld [vmem:[%s7266_s6 + $0x1c0] sm:$0xff] }
 0xc6b   :  { %6182 = vmatpush3.msra.mxu0 %v5385_v10  ;;  %v6139_v15 = vpop.f32.mrf.mxu1  ;;  %6189 = vmatprep.mubr.msk.f32.mxu0 %vm69_vm0, %v6497_v35  ;;  %v5431_v10 = vld [vmem:[%s7266_s6 + $0x1d8] sm:$0xff] }
 0xc6c   :  { %6183 = vmatprep.subr.mxu0 %v5384_v14 }
 0xc6d   :  { %6184 = vmatpush3.msra.mxu0 %v5384_v14 }
 0xc6e   :  { %6185 = vmatprep.subr.mxu0 %v5383_v16 }
 0xc6f   :  { %6186 = vmatpush3.msra.mxu0 %v5383_v16 }
 0xc70   :  { %6187 = vmatprep.subr.mxu0 %v5382_v17 }
 0xc71   :  { %6188 = vmatpush3.msra.mxu0 %v5382_v17  ;;  %v6169_v18 = vpop.f32.mrf.mxu1 }
 0xc72   :  { %6190 = vmatmul.mubr.msk.f32.vlgmr.msra.gmra.mxu0 %vm69_vm0, %v6503_v38  ;;  %6202 = vmatprep.subr.mxu0 %v6406_v42 }
 0xc73   :  { %6204 = vmatprep.mubr.msk.f32.mxu0 %vm6407_vm1, %v6406_v42  ;;  %v3966_v19 = vpop.f32.mrf.mxu1 }
 0xc79   :  { %v6180_v20 = vpop.f32.mrf.mxu1 }
 0xc7b   :  { %v4046_v21 = vpop.f32.mrf.mxu1 }
 0xc7c   :  { %6193 = vmatpush3.xpose.msk.msra.mxu1 %vm358_vm2, %v4046_v21 }
 0xc7d   :  { %6197 = vmatprep.subr.mxu1 %v6406_v42 }
 0xc7f   :  { %6195 = vmatmul.mubr.msk.f32.vlgmr.msra.gmra.mxu1 %vm358_vm2, %v3966_v19  ;;  %v5438_v19 = vld [vmem:[%s7267_s7] ss:$0 sm:$0xff] }
 0xc80   :  { %6198 = vmatpush3.xpose.msk.msra.mxu1 %vm358_vm2, %v6180_v20  ;;  %6199 = vmatprep.mubr.msk.f32.mxu1 %vm6407_vm1, %v6406_v42 }
 0xc81   :  { %6207 = vmatprep.subr.mxu1 %v6406_v42 }
 0xc83   :  { %6200 = vmatmul.mubr.msk.f32.vlgmr.msra.gmra.mxu1 %vm358_vm2, %v6169_v18 }
 0xc84   :  { %6209 = vmatprep.mubr.msk.f32.mxu1 %vm6407_vm1, %v6406_v42 }
 0xd2a   :  { %v6158_v22 = vpop.f32.mrf.mxu0 }
 0xd2b   :  { %v7122_v23 = vadd.f32 %v6158_v22, %v7024_v49  ;;  %v5395_v49 = vld [vmem:[%s7266_s6 + $0x188] sm:$0xff] }
 0xd2c   :  { %v3884_v24 = vpop.f32.mrf.mxu0 }
 0xd2d   :  { %v7125_v25 = vadd.f32 %v3884_v24, %v7027_v51  ;;  %v5419_v51 = vld [vmem:[%s7265_s5 + $0xf8] sm:$0xff] }
 0xd32   :  { %v6191_v27 = vpop.f32.mrf.mxu0 }
 0xd33   :  { %6208 = vmatpush3.msra.mxu1 %v6191_v27 }
 0xd34   :  { %v4126_v29 = vpop.f32.mrf.mxu0  ;;  %6231 = vmatprep.subr.mxu1 %v5407_v26 }
 0xd35   :  { %6203 = vmatpush3.msra.mxu0 %v4126_v29 }
 0xd36   :  { %6212 = vmatprep.subr.mxu0 %v5401_v28 }
 0xd3f   :  { %v4207_v30 = vpop.f32.mrf.mxu1 }
 0xd40   :  { %6205 = vmatmul.mubr.msk.f32.vlgmr.msra.gmra.mxu0 %vm511_vm3, %v4207_v30 }
 0xd41   :  { %v6196_v32 = vpop.f32.mrf.mxu1  ;;  %6213 = vmatpush3.msra.mxu0 %v5401_v28 }
 0xd42   :  { %6214 = vmatprep.subr.mxu0 %v5400_v31 }
 0xd43   :  { %v4283_v34 = vpop.f32.mrf.mxu1  ;;  %6215 = vmatpush3.msra.mxu0 %v5400_v31 }
 0xd44   :  { %6210 = vmatmul.mubr.msk.f32.vlgmr.msra.gmra.mxu1 %vm511_vm3, %v4283_v34  ;;  %6216 = vmatprep.subr.mxu0 %v5399_v33 }
 0xd45   :  { %6232 = vmatpush3.msra.mxu1 %v5407_v26  ;;  %v6201_v39 = vpop.f32.mrf.mxu1  ;;  %6239 = vmatprep.mubr.msk.f32.mxu1 %vm69_vm0, %v6497_v35 }
 0xd46   :  { %6233 = vmatprep.subr.mxu1 %v5406_v36  ;;  %6217 = vmatpush3.msra.mxu0 %v5399_v33 }
 0xd47   :  { %6234 = vmatpush3.msra.mxu1 %v5406_v36  ;;  %6218 = vmatprep.subr.mxu0 %v5398_v37 }
 0xd48   :  { %6235 = vmatprep.subr.mxu1 %v5405_v40  ;;  %6219 = vmatpush3.msra.mxu0 %v5398_v37 }
 0xd49   :  { %6236 = vmatpush3.msra.mxu1 %v5405_v40  ;;  %6220 = vmatprep.subr.mxu0 %v5397_v41 }
 0xd4a   :  { %6237 = vmatprep.subr.mxu1 %v5404_v43  ;;  %6221 = vmatpush3.msra.mxu0 %v5397_v41 }
 0xd4b   :  { %6238 = vmatpush3.msra.mxu1 %v5404_v43  ;;  %6222 = vmatprep.subr.mxu0 %v5396_v44 }
 0xd4c   :  { %6240 = vmatmul.mubr.msk.f32.vlgmr.msra.gmra.mxu1 %vm69_vm0, %v6503_v38  ;;  %6242 = vmatprep.subr.mxu1 %v5413_v45 }
 0xd4d   :  { %6243 = vmatpush3.msra.mxu1 %v5413_v45  ;;  %6250 = vmatprep.mubr.msk.f32.mxu1 %vm69_vm0, %v6497_v35 }
 0xd4e   :  { %6244 = vmatprep.subr.mxu1 %v5412_v46  ;;  %6223 = vmatpush3.msra.mxu0 %v5396_v44 }
 0xd4f   :  { %6245 = vmatpush3.msra.mxu1 %v5412_v46  ;;  %6224 = vmatprep.subr.mxu0 %v5395_v49 }
 0xd50   :  { %6246 = vmatprep.subr.mxu1 %v5411_v47  ;;  %6225 = vmatpush3.msra.mxu0 %v5395_v49 }
 0xd51   :  { %6247 = vmatpush3.msra.mxu1 %v5411_v47  ;;  %6226 = vmatprep.subr.mxu0 %v5394_v50 }
 0xd52   :  { %6248 = vmatprep.subr.mxu1 %v5410_v48  ;;  %6227 = vmatpush3.msra.mxu0 %v5394_v50 }
 0xd53   :  { %6249 = vmatpush3.msra.mxu1 %v5410_v48  ;;  %6253 = vmatprep.subr.mxu0 %v5419_v51 }
 0xd54   :  { %6251 = vmatmul.mubr.msk.f32.vlgmr.msra.gmra.mxu1 %vm69_vm0, %v6503_v38  ;;  %6264 = vmatprep.subr.mxu1 %v6406_v42 }
 0xd55   :  { %6266 = vmatprep.mubr.msk.f32.mxu1 %vm6407_vm1, %v6406_v42 }
 0xe00   :  { %v4356_v52 = vpop.f32.mrf.mxu0 }
 0xe01   :  { %6228 = vmatprep.mubr.msk.f32.mxu0 %vm358_vm2, %v4356_v52 }
 0xe02   :  { %v6206_v53 = vpop.f32.mrf.mxu0 }
 0xe04   :  { %v4429_v54 = vpop.f32.mrf.mxu1 }
 0xe05   :  { %6229 = vmatmul.mubr.msk.f32.vlgmr.msra.gmra.mxu0 %vm358_vm2, %v4429_v54 }
 0xe06   :  { %6254 = vmatpush3.msra.mxu0 %v5419_v51  ;;  %v6211_v56 = vpop.f32.mrf.mxu1  ;;  %6261 = vmatprep.mubr.msk.f32.mxu0 %vm69_vm0, %v6497_v35 }
 0xe07   :  { %6255 = vmatprep.subr.mxu0 %v5418_v55 }
 0xe08   :  { %6256 = vmatpush3.msra.mxu0 %v5418_v55 }
 0xe09   :  { %6257 = vmatprep.subr.mxu0 %v5417_v57 }
 0xe0a   :  { %6258 = vmatpush3.msra.mxu0 %v5417_v57 }
 0xe0b   :  { %6259 = vmatprep.subr.mxu0 %v5416_v58 }
 0xe0c   :  { %6260 = vmatpush3.msra.mxu0 %v5416_v58  ;;  %v6241_v35 = vpop.f32.mrf.mxu1 }
 0xe0d   :  { %6262 = vmatmul.mubr.msk.f32.vlgmr.msra.gmra.mxu0 %vm69_vm0, %v6503_v38  ;;  %6274 = vmatprep.subr.mxu0 %v6406_v42 }
 0xe0e   :  { %6276 = vmatprep.mubr.msk.f32.mxu0 %vm6407_vm1, %v6406_v42  ;;  %v4596_v59 = vpop.f32.mrf.mxu1 }
 0xe14   :  { %v6252_v60 = vpop.f32.mrf.mxu1 }
 0xe16   :  { %v4676_v61 = vpop.f32.mrf.mxu1 }
 0xe17   :  { %6265 = vmatpush3.xpose.msk.msra.mxu1 %vm358_vm2, %v4676_v61 }
 0xe18   :  { %6269 = vmatprep.subr.mxu1 %v6406_v42 }
 0xe1a   :  { %6267 = vmatmul.mubr.msk.f32.vlgmr.msra.gmra.mxu1 %vm358_vm2, %v4596_v59 }
 0xe1b   :  { %6270 = vmatpush3.xpose.msk.msra.mxu1 %vm358_vm2, %v6252_v60  ;;  %6271 = vmatprep.mubr.msk.f32.mxu1 %vm6407_vm1, %v6406_v42 }
 0xe1c   :  { %6279 = vmatprep.subr.mxu1 %v6406_v42 }
 0xe1e   :  { %6272 = vmatmul.mubr.msk.f32.vlgmr.msra.gmra.mxu1 %vm358_vm2, %v6241_v35 }
 0xe1f   :  { %6281 = vmatprep.mubr.msk.f32.mxu1 %vm6407_vm1, %v6406_v42  ;;  %v5434_v42 = vld [vmem:[%s7266_s6 + $0x1f0] sm:$0xff]  ;;  %s6375_s6 = scalar_lea.vmem %s5172_s1, 256 }
 0xe20   :  { %p6376_p1 = scmp.ne.s32.totalorder %s5172_s1, %s6375_s6  ;;  %p6381_p3 = scmp.lt.s32.totalorder %s6375_s6, %s6375_s6 }
 0xe22   :  { %p6382_p4 = por %p6381_p3, %p6380_p2 }
 0xe24   :  { %p6383_p5 = pnand %p6382_p4, %p6376_p1 }
 0xec5   :  { %v6230_v38 = vpop.f32.mrf.mxu0 }
 0xec6   :  { %v4524_v62 = vadd.f32 %v6230_v38, %v7122_v23 }
 0xec7   :  { %v4514_v63 = vpop.f32.mrf.mxu0 }
 0xec8   :  { %v4523_v0 = vadd.f32 %v4514_v63, %v7125_v25 }
 0xecd   :  { %v6263_v1 = vpop.f32.mrf.mxu0 }
 0xece   :  { %6280 = vmatpush3.msra.mxu1 %v6263_v1 }
 0xecf   :  { %v4756_v3 = vpop.f32.mrf.mxu0 }
 0xed0   :  { %6275 = vmatpush3.msra.mxu0 %v4756_v3 }
 0xed1   :  { %6284 = vmatprep.subr.mxu0 %v5435_v2 }
 0xeda   :  { %v4837_v4 = vpop.f32.mrf.mxu1 }
 0xedb   :  { %6277 = vmatmul.mubr.msk.f32.vlgmr.msra.gmra.mxu0 %vm511_vm3, %v4837_v4 }
 0xedc   :  { %v6268_v5 = vpop.f32.mrf.mxu1  ;;  %6285 = vmatpush3.msra.mxu0 %v5435_v2 }
 0xedd   :  { %6286 = vmatprep.subr.mxu0 %v5434_v42 }
 0xede   :  { %v4913_v7 = vpop.f32.mrf.mxu1  ;;  %6287 = vmatpush3.msra.mxu0 %v5434_v42 }
 0xedf   :  { %6282 = vmatmul.mubr.msk.f32.vlgmr.msra.gmra.mxu1 %vm511_vm3, %v4913_v7  ;;  %6288 = vmatprep.subr.mxu0 %v5433_v6 }
 0xee0   :  { %v6273_v9 = vpop.f32.mrf.mxu1  ;;  %6289 = vmatpush3.msra.mxu0 %v5433_v6 }
 0xee1   :  { %6290 = vmatprep.subr.mxu0 %v5432_v8 }
 0xee2   :  { %6291 = vmatpush3.msra.mxu0 %v5432_v8 }
 0xee3   :  { %6292 = vmatprep.subr.mxu0 %v5431_v10 }
 0xee4   :  { %6293 = vmatpush3.msra.mxu0 %v5431_v10 }
 0xee5   :  { %6294 = vmatprep.subr.mxu0 %v5430_v11 }
 0xee6   :  { %6295 = vmatpush3.msra.mxu0 %v5430_v11 }
 0xee7   :  { %6296 = vmatprep.subr.mxu0 %v5429_v12 }
 0xee8   :  { %6297 = vmatpush3.msra.mxu0 %v5429_v12 }
 0xee9   :  { %6298 = vmatprep.subr.mxu0 %v5428_v13 }
 0xeea   :  { %6299 = vmatpush3.msra.mxu0 %v5428_v13 }
 0xf9b   :  { %v4986_v14 = vpop.f32.mrf.mxu0 }
 0xf9c   :  { %6300 = vmatprep.mubr.msk.f32.mxu0 %vm358_vm2, %v4986_v14 }
 0xf9d   :  { %v6278_v15 = vpop.f32.mrf.mxu0 }
 0xf9f   :  { %v5059_v16 = vpop.f32.mrf.mxu1 }
 0xfa0   :  { %6301 = vmatmul.mubr.msk.f32.vlgmr.msra.gmra.mxu0 %vm358_vm2, %v5059_v16 }
 0xfa1   :  { %v6283_v17 = vpop.f32.mrf.mxu1 }
0x1060   :  { %v6302_v18 = vpop.f32.mrf.mxu0 }
0x1061   :  { %v5154_v20 = vadd.f32 %v6302_v18, %v4524_v62 }
0x1062   :  { %v5144_v21 = vpop.f32.mrf.mxu0 }
0x1063   :  { %v5163_v22 = vadd.f32 %v5438_v19, %v5154_v20  ;;  %v5153_v23 = vadd.f32 %v5144_v21, %v4523_v0 }
0x1065   :  { %5165 = vst.msk [vmem:[#allocation8 + $0x8] sm:$0xff] %vm69_vm0, %v5163_v22  ;;  %v5162_v24 = vadd.f32 %v5438_v19, %v5153_v23 }
0x1067   :  { %5164 = vst.msk [vmem:[#allocation8] sm:$0xff] %vm69_vm0, %v5162_v24 }
0x1068   :  { %6386 = shalt.err (!%p6383_p5)
}
0x1069   :  { %5177 = dma.vmem_to_hbm [thread:$0]  %s5172_s1, 256, %s7268_s8, [#allocation4], %s6403_s14, %s6403_s14, %s6404_s15  }
0x106a   :  { %6399 = dma.done.wait [#allocation4], 256  }
0x106b   :  { %6400 = vsyncadd [#allocation4], 4294967040 }
0x106c   :  { %5181 = vsyncpa [#allocation3], 1 }
0x106d   :  { %5182 = vsyncpa [#allocation6], 1 }
0x106e   :  { %5183 = vsyncpa [#allocation4], 1 }

</bundles_post_ra>
